<compile_context>
chip_gen: v5e
topology: v5e:2x2
jax: 0.10.0
libtpu: 0.0.40
codegen_flags: <defaults>
</compile_context>

<pallas_src>
import functools

import jax
import jax.numpy as jnp
from jax.experimental import pallas as pl
from jax.experimental.pallas import tpu as pltpu


NUM_LAYERS = 2


# ----------------------------------------------------------------------------
# Recurrent kernel: 2-layer LSTM over one (batch block, time block) slab
# ----------------------------------------------------------------------------
def _lstm_kernel(
    x_ref,                        # (Bb, TB, I)   input slab (batch-major)
    wih0_ref, b0_ref,             # (I, 4H) bf16, (1, 4H) f32
    whh0_ref,                     # (H, 4H) bf16
    wih1_ref, whh1_ref, b1_ref,   # (H, 4H) bf16, (H, 4H) bf16, (1, 4H) f32
    h_out_ref,                    # (Bb, TB, H) bf16   top-layer hidden per step
    hn_ref, cn_ref,               # (Bb, 2, H) f32     final LSTM state
    h_sc, c_sc,                   # scratch (2, Bb, H) bf16 / f32, persistent
):
    Bb, TB, I = x_ref.shape
    H = whh0_ref.shape[0]
    t_blk = pl.program_id(1)
    n_t = pl.num_programs(1)

    # initial_state is all-zeros in the PyTorch module. Scratch persists across
    # grid steps of the sequential time axis; re-init at t==0 for every batch
    # block (and per-core on v7x megacore).
    @pl.when(t_blk == 0)
    def _():
        h_sc[...] = jnp.zeros_like(h_sc)
        c_sc[...] = jnp.zeros_like(c_sc)

    # --- Hoisted layer-0 input projection: one MXU GEMM for the whole slab ---
    x_slab = x_ref[...].reshape(Bb * TB, I).astype(jnp.bfloat16)
    xg0 = jnp.dot(x_slab, wih0_ref[...], preferred_element_type=jnp.float32)
    xg0 = (xg0 + b0_ref[...]).reshape(Bb, TB, 4 * H)        # bias folded in once

    # Loop-invariant values hoisted out of the unrolled time loop.
    b1 = jnp.broadcast_to(b1_ref[...], (Bb, 4 * H))
    whh0 = whh0_ref[...]
    wih1 = wih1_ref[...]
    whh1 = whh1_ref[...]

    # State lives in registers across the unrolled time loop.
    h0 = h_sc[0]
    c0 = c_sc[0]
    h1 = h_sc[1]
    c1 = c_sc[1]

    def gates_to_state(g, c_prev):
        # PyTorch gate order [i, f, g, o]; element-wise gate math in f32
        # (keep f32 on v5e which has no bf16 VPU/EUP path).
        i = jax.nn.sigmoid(g[:, 0 * H:1 * H])
        f = jax.nn.sigmoid(g[:, 1 * H:2 * H])
        gg = jnp.tanh(g[:, 2 * H:3 * H])
        o = jax.nn.sigmoid(g[:, 3 * H:4 * H])
        c_new = f * c_prev + i * gg
        h_new = o * jnp.tanh(c_new)
        # h only feeds bf16 matmuls / bf16 h_all -> carry it in bf16.
        return h_new.astype(jnp.bfloat16), c_new

    # Fully-unrolled time loop; all slice / store indices are static.
    for s in range(TB):
        # layer 0: recurrent part only, K = H (input part pre-computed above)
        g0 = xg0[:, s, :] + jnp.dot(h0, whh0, preferred_element_type=jnp.float32)
        h0, c0 = gates_to_state(g0, c0)

        # layer 1: two clean K = H matmuls (no concat)
        g1 = (jnp.dot(h0, wih1, preferred_element_type=jnp.float32)
              + jnp.dot(h1, whh1, preferred_element_type=jnp.float32)
              + b1)
        h1, c1 = gates_to_state(g1, c1)

        h_out_ref[:, s, :] = h1

    # Persist state across time blocks (once per block, not per step).
    h_sc[0] = h0
    c_sc[0] = c0
    h_sc[1] = h1
    c_sc[1] = c1

    # Final-state writeback: hn/cn blocks are indexed by the batch-block axis
    # only, so each core (v7x) / batch block writes a disjoint slab; safe
    # because the time axis is the sole sequential ("arbitrary") axis.
    @pl.when(t_blk == n_t - 1)
    def _():
        hn_ref[:, 0, :] = h0.astype(jnp.float32)
        hn_ref[:, 1, :] = h1.astype(jnp.float32)
        cn_ref[:, 0, :] = c0
        cn_ref[:, 1, :] = c1


# ----------------------------------------------------------------------------
# fc kernel: one bf16 GEMM with a lane-dense (128-padded) f32 output slab
# ----------------------------------------------------------------------------
def _fc_kernel(x_ref, w_ref, b_ref, o_ref):
    o_ref[...] = (
        jnp.dot(x_ref[...], w_ref[...], preferred_element_type=jnp.float32)
        + b_ref[...]
    )


def _fc(x_bf16, w, b, *, max_rows=1024):
    """(M, H) bf16 @ (H, OUT) bf16 -> f32, OUT padded to a multiple of 128."""
    M, H = x_bf16.shape
    OUT = w.shape[1]
    OUT_pad = ((OUT + 127) // 128) * 128
    if OUT_pad != OUT:
        w = jnp.pad(w, ((0, 0), (0, OUT_pad - OUT)))
        b = jnp.pad(b, ((0, 0), (0, OUT_pad - OUT)))
    w = w.astype(jnp.bfloat16)
    b = b.astype(jnp.float32)
    TM = M if M <= max_rows else max_rows

    out = pl.pallas_call(
        _fc_kernel,
        out_shape=jax.ShapeDtypeStruct((M, OUT_pad), jnp.float32),
        grid_spec=pltpu.PrefetchScalarGridSpec(
            num_scalar_prefetch=0,
            grid=(pl.cdiv(M, TM),),
            in_specs=[
                pl.BlockSpec((TM, H), lambda i: (i, 0)),
                pl.BlockSpec((H, OUT_pad), lambda i: (0, 0)),   # resident weight
                pl.BlockSpec((1, OUT_pad), lambda i: (0, 0)),
            ],
            out_specs=pl.BlockSpec((TM, OUT_pad), lambda i: (i, 0)),
        ),
        compiler_params=pltpu.CompilerParams(
            dimension_semantics=("parallel",),
        ),
    )(x_bf16, w, b)
    return out[:, :OUT]


# ----------------------------------------------------------------------------
# Wrapper
# ----------------------------------------------------------------------------
def _pick_time_block(T, max_tb):
    # Block second-to-last dim constraint: TB must be a multiple of 8 or == T.
    best = None
    for tb in range(8, min(T, max_tb) + 1, 8):
        if T % tb == 0:
            best = tb
    return best if best is not None else T


def rnn_forward(x, params, *, max_time_block=32, batch_blocks=None):
    """x: (B, T, I) f32 -> (out (B, T, OUT), (h_n (2, B, H), c_n (2, B, H)))."""
    B, T, I = x.shape
    H = params["w_hh0"].shape[0]
    OUT = params["w_fc"].shape[1]

    if batch_blocks is None:
        batch_blocks = 2 if (B % 2 == 0 and B >= 2) else 1
    Bb = B // batch_blocks

    TB = _pick_time_block(T, max_time_block)
    n_blk = T // TB

    # Gate weights fed as bf16 (halved VMEM + DMA, bf16 MXU); f32 accumulation
    # happens in-kernel via preferred_element_type. Biases stay f32.
    wih0 = params["w_ih0"].astype(jnp.bfloat16)
    whh0 = params["w_hh0"].astype(jnp.bfloat16)
    wih1 = params["w_ih1"].astype(jnp.bfloat16)
    whh1 = params["w_hh1"].astype(jnp.bfloat16)
    b0 = params["b0"].astype(jnp.float32)
    b1 = params["b1"].astype(jnp.float32)

    h_all, hn_blh, cn_blh = pl.pallas_call(
        _lstm_kernel,
        out_shape=(
            jax.ShapeDtypeStruct((B, T, H), jnp.bfloat16),          # bf16 h_all
            jax.ShapeDtypeStruct((B, NUM_LAYERS, H), jnp.float32),  # h_n (B-major)
            jax.ShapeDtypeStruct((B, NUM_LAYERS, H), jnp.float32),  # c_n (B-major)
        ),
        grid_spec=pltpu.PrefetchScalarGridSpec(
            num_scalar_prefetch=0,
            grid=(batch_blocks, n_blk),
            in_specs=[
                pl.BlockSpec((Bb, TB, I), lambda b, t: (b, t, 0)),   # x slab
                pl.BlockSpec((I, 4 * H), lambda b, t: (0, 0)),       # W_ih0 (resident)
                pl.BlockSpec((1, 4 * H), lambda b, t: (0, 0)),       # b0
                pl.BlockSpec((H, 4 * H), lambda b, t: (0, 0)),       # W_hh0
                pl.BlockSpec((H, 4 * H), lambda b, t: (0, 0)),       # W_ih1
                pl.BlockSpec((H, 4 * H), lambda b, t: (0, 0)),       # W_hh1
                pl.BlockSpec((1, 4 * H), lambda b, t: (0, 0)),       # b1
            ],
            out_specs=(
                pl.BlockSpec((Bb, TB, H), lambda b, t: (b, t, 0)),
                pl.BlockSpec((Bb, NUM_LAYERS, H), lambda b, t: (b, 0, 0)),
                pl.BlockSpec((Bb, NUM_LAYERS, H), lambda b, t: (b, 0, 0)),
            ),
            scratch_shapes=[
                pltpu.VMEM((NUM_LAYERS, Bb, H), jnp.bfloat16),       # h state
                pltpu.VMEM((NUM_LAYERS, Bb, H), jnp.float32),        # c state
            ],
        ),
        compiler_params=pltpu.CompilerParams(
            # batch axis parallel (v7x: sharded over the 2 TCs);
            # time axis is the inherently sequential recurrence.
            dimension_semantics=("parallel", "arbitrary"),
            # Notes for larger shapes (not needed at these sizes):
            #  * v5e: set vmem_limit_bytes when scaling B/TB (16 MiB default).
            #  * v7x: pipeline_mode=pl.Buffered(1) on the constant-index
            #    weight/bias specs frees a little VMEM headroom.
        ),
    )(x, wih0, b0, whh0, wih1, whh1, b1)

    # fc hoisted out of the recurrence: one bf16 (B*T, H) @ (H, OUT) matmul;
    # h_all is batch-major so no activation transpose is needed anywhere.
    out_flat = _fc(h_all.reshape(B * T, H), params["w_fc"], params["b_fc"])
    out = out_flat.reshape(B, T, OUT)

    # Only the tiny final state needs a layout change to match (layers, B, H).
    h_n = jnp.transpose(hn_blh, (1, 0, 2))
    c_n = jnp.transpose(cn_blh, (1, 0, 2))
    return out, (h_n, c_n)


# ----------------------------------------------------------------------------
# Deterministic parameter init (mirrors nn.LSTM / nn.Linear + init_weight())
# ----------------------------------------------------------------------------
def init_params(key, input_size, hidden, num_classes):
    H = hidden
    out_dim = num_classes + 4 * H
    k_lstm = float(1.0 / (H ** 0.5))
    keys = jax.random.split(key, 9)

    def u(k, shape, lim):
        return jax.random.uniform(k, shape, jnp.float32, -lim, lim)

    # PyTorch stores LSTM weights as (4H, in); we keep them transposed.
    w_ih0 = u(keys[0], (input_size, 4 * H), k_lstm)
    w_hh0 = u(keys[1], (H, 4 * H), k_lstm)
    b_ih0 = u(keys[2], (4 * H,), k_lstm)
    b_hh0 = u(keys[3], (4 * H,), k_lstm)
    w_ih1 = u(keys[4], (H, 4 * H), k_lstm)
    w_hh1 = u(keys[5], (H, 4 * H), k_lstm)
    b_ih1 = u(keys[6], (4 * H,), k_lstm)
    b_hh1 = u(keys[7], (4 * H,), k_lstm)

    # init_weight(): forget-gate bias slice [H:2H] of EVERY LSTM bias <- 0
    # (PyTorch loops over all names containing 'bias', i.e. both b_ih and b_hh).
    zero_forget = lambda bb: bb.at[H:2 * H].set(0.0)
    b0 = (zero_forget(b_ih0) + zero_forget(b_hh0)).reshape(1, 4 * H)
    b1 = (zero_forget(b_ih1) + zero_forget(b_hh1)).reshape(1, 4 * H)

    # fc: weight ~ U(-0.1, 0.1), bias = 0
    w_fc = u(keys[8], (H, out_dim), 0.1)
    b_fc = jnp.zeros((1, out_dim), jnp.float32)

    return dict(
        w_ih0=w_ih0, w_hh0=w_hh0, b0=b0,
        w_ih1=w_ih1, w_hh1=w_hh1, b1=b1,
        w_fc=w_fc, b_fc=b_fc,
    )


# ----------------------------------------------------------------------------
# Pure-JAX reference (matmul operands cast to bf16 with f32 accumulation, to
# mirror the kernel's MXU precision; recurrence / gate math is independent code)
# NOTE: bf16 matmul operands mean long sequences drift slightly vs a pure-f32
# PyTorch LSTM; acceptable at these tolerances.
# ----------------------------------------------------------------------------
def rnn_reference(x, p):
    B, T, I = x.shape
    H = p["w_hh0"].shape[0]

    def mm(a, b):
        return jnp.dot(a.astype(jnp.bfloat16), b.astype(jnp.bfloat16),
                       preferred_element_type=jnp.float32)

    def cell(xt, hp, cp, wih, whh, b):
        g = mm(xt, wih) + mm(hp, whh) + b
        i = jax.nn.sigmoid(g[:, :H])
        f = jax.nn.sigmoid(g[:, H:2 * H])
        gg = jnp.tanh(g[:, 2 * H:3 * H])
        o = jax.nn.sigmoid(g[:, 3 * H:])
        cn = f * cp + i * gg
        return o * jnp.tanh(cn), cn

    h0 = c0 = h1 = c1 = jnp.zeros((B, H), jnp.float32)
    outs = []
    for t in range(T):
        xt = x[:, t]
        h0, c0 = cell(xt, h0, c0, p["w_ih0"], p["w_hh0"], p["b0"])
        h1, c1 = cell(h0, h1, c1, p["w_ih1"], p["w_hh1"], p["b1"])
        outs.append(mm(h1, p["w_fc"]) + p["b_fc"])
    out = jnp.stack(outs, axis=1)
    return out, (jnp.stack([h0, h1]), jnp.stack([c0, c1]))


if __name__ == "__main__":
    # Small shapes consistent with the module (input_size=28, num_classes=10,
    # num_layers=2), scaled-down batch / seq / hidden. T=16 with
    # max_time_block=8 -> 2 time blocks, and B=2 -> 2 batch blocks, so the
    # cross-block h/c carry, the last-block hn/cn writeback, and the
    # batch-parallel split are all exercised.
    B, T, I, H, NC = 2, 16, 28, 32, 10

    key = jax.random.PRNGKey(0)
    pkey, xkey = jax.random.split(key)
    params = init_params(pkey, I, H, NC)
    x = jax.random.normal(xkey, (B, T, I), jnp.float32)

    fwd = jax.jit(functools.partial(rnn_forward, max_time_block=8))
    out, (h_n, c_n) = jax.block_until_ready(fwd(x, params))

    ref_out, (ref_h, ref_c) = rnn_reference(x, params)
    assert out.shape == (B, T, NC + 4 * H)
    assert h_n.shape == (2, B, H) and c_n.shape == (2, B, H)
    assert jnp.allclose(out, ref_out, atol=2e-2, rtol=2e-2)
    assert jnp.allclose(h_n, ref_h, atol=2e-2, rtol=2e-2)
    assert jnp.allclose(c_n, ref_c, atol=2e-2, rtol=2e-2)

    print("KERNEL_OK")
</pallas_src>

<mosaic_0001>
module attributes {stable_mosaic.version = 11 : i64} {
  func.func @_fc_kernel(%arg0: i32, %arg1: memref<32x32xbf16, #tpu.memory_space<vmem>>, %arg2: memref<32x256xbf16, #tpu.memory_space<vmem>>, %arg3: memref<1x256xf32, #tpu.memory_space<vmem>>, %arg4: memref<32x256xf32, #tpu.memory_space<vmem>>) attributes {dimension_semantics = [#tpu.dimension_semantics<parallel>], iteration_bounds = array<i64: 1>, scalar_prefetch = 0 : i64, scratch_operands = 0 : i64, tpu.core_type = #tpu.core_type<tc>, window_params = [{transform_indices = @transform_0, window_bounds = array<i64: 32, 32>}, {pipeline_mode = #tpu.pipeline_mode<synchronous>, transform_indices = @transform_1, window_bounds = array<i64: 32, 256>}, {pipeline_mode = #tpu.pipeline_mode<synchronous>, transform_indices = @transform_2, window_bounds = array<i64: 1, 256>}, {transform_indices = @transform_3, window_bounds = array<i64: 32, 256>}]} {
    %c0 = arith.constant 0 : index
    %c0_0 = arith.constant 0 : index
    %0 = vector.load %arg1[%c0, %c0_0] : memref<32x32xbf16, #tpu.memory_space<vmem>>, vector<32x32xbf16>
    %c0_1 = arith.constant 0 : index
    %c0_2 = arith.constant 0 : index
    %1 = vector.load %arg2[%c0_1, %c0_2] : memref<32x256xbf16, #tpu.memory_space<vmem>>, vector<32x256xbf16>
    %cst = arith.constant dense<0.000000e+00> : vector<32x256xf32>
    %2 = tpu.matmul %0, %1, %cst {dimension_numbers = #tpu.dot_dimension_numbers<[1], [0], [0], [1], [0, 0, 1, 1], [], []>} : vector<32x32xbf16>, vector<32x256xbf16>, vector<32x256xf32> -> vector<32x256xf32>
    %c0_3 = arith.constant 0 : index
    %c0_4 = arith.constant 0 : index
    %3 = vector.load %arg3[%c0_3, %c0_4] : memref<1x256xf32, #tpu.memory_space<vmem>>, vector<1x256xf32>
    %4 = vector.broadcast %3 : vector<1x256xf32> to vector<32x256xf32>
    %5 = arith.addf %2, %4 : vector<32x256xf32>
    %c0_5 = arith.constant 0 : index
    %c0_6 = arith.constant 0 : index
    %6 = vector.load %arg4[%c0_5, %c0_6] : memref<32x256xf32, #tpu.memory_space<vmem>>, vector<32x256xf32>
    tpu.vector_store %arg4[%c0_5, %c0_6], %5 {strides = array<i32>} : memref<32x256xf32, #tpu.memory_space<vmem>>, vector<32x256xf32>,
    return
  }
  func.func @transform_0(%arg0: i32) -> (i32, i32) {
    %c0_i32 = arith.constant 0 : i32
    %c0_i32_0 = arith.constant 0 : i32
    return %arg0, %c0_i32 : i32, i32
  }
  func.func @transform_1(%arg0: i32) -> (i32, i32) {
    %c0_i32 = arith.constant 0 : i32
    %c0_i32_0 = arith.constant 0 : i32
    %c0_i32_1 = arith.constant 0 : i32
    return %c0_i32, %c0_i32_0 : i32, i32
  }
  func.func @transform_2(%arg0: i32) -> (i32, i32) {
    %c0_i32 = arith.constant 0 : i32
    %c0_i32_0 = arith.constant 0 : i32
    %c0_i32_1 = arith.constant 0 : i32
    return %c0_i32, %c0_i32_0 : i32, i32
  }
  func.func @transform_3(%arg0: i32) -> (i32, i32) {
    %c0_i32 = arith.constant 0 : i32
    %c0_i32_0 = arith.constant 0 : i32
    return %arg0, %c0_i32 : i32, i32
  }
}

module attributes {stable_mosaic.version = 11 : i64} {
  func.func @_lstm_kernel(%arg0: i32, %arg1: i32, %arg2: memref<1x8x28xf32, #tpu.memory_space<vmem>>, %arg3: memref<28x128xbf16, #tpu.memory_space<vmem>>, %arg4: memref<1x128xf32, #tpu.memory_space<vmem>>, %arg5: memref<32x128xbf16, #tpu.memory_space<vmem>>, %arg6: memref<32x128xbf16, #tpu.memory_space<vmem>>, %arg7: memref<32x128xbf16, #tpu.memory_space<vmem>>, %arg8: memref<1x128xf32, #tpu.memory_space<vmem>>, %arg9: memref<1x8x32xbf16, #tpu.memory_space<vmem>>, %arg10: memref<1x2x32xf32, #tpu.memory_space<vmem>>, %arg11: memref<1x2x32xf32, #tpu.memory_space<vmem>>, %arg12: memref<2x1x32xbf16, #tpu.memory_space<vmem>>, %arg13: memref<2x1x32xf32, #tpu.memory_space<vmem>>) attributes {dimension_semantics = [#tpu.dimension_semantics<parallel>, #tpu.dimension_semantics<arbitrary>], iteration_bounds = array<i64: 2, 2>, scalar_prefetch = 0 : i64, scratch_operands = 2 : i64, tpu.core_type = #tpu.core_type<tc>, window_params = [{transform_indices = @transform_0, window_bounds = array<i64: 1, 8, 28>}, {pipeline_mode = #tpu.pipeline_mode<synchronous>, transform_indices = @transform_1, window_bounds = array<i64: 28, 128>}, {pipeline_mode = #tpu.pipeline_mode<synchronous>, transform_indices = @transform_2, window_bounds = array<i64: 1, 128>}, {pipeline_mode = #tpu.pipeline_mode<synchronous>, transform_indices = @transform_3, window_bounds = array<i64: 32, 128>}, {pipeline_mode = #tpu.pipeline_mode<synchronous>, transform_indices = @transform_4, window_bounds = array<i64: 32, 128>}, {pipeline_mode = #tpu.pipeline_mode<synchronous>, transform_indices = @transform_5, window_bounds = array<i64: 32, 128>}, {pipeline_mode = #tpu.pipeline_mode<synchronous>, transform_indices = @transform_6, window_bounds = array<i64: 1, 128>}, {transform_indices = @transform_7, window_bounds = array<i64: 1, 8, 32>}, {transform_indices = @transform_8, window_bounds = array<i64: 1, 2, 32>}, {transform_indices = @transform_9, window_bounds = array<i64: 1, 2, 32>}]} {
    %c0_i32 = arith.constant 0 : i32
    %0 = arith.cmpi eq, %arg1, %c0_i32 : i32
    %1 = arith.extui %0 : i1 to i32
    %c0_i32_0 = arith.constant 0 : i32
    %2 = arith.cmpi ne, %1, %c0_i32_0 : i32
    scf.if %2 {
      %cst_129 = arith.constant 0.000000e+00 : bf16
      %543 = vector.broadcast %cst_129 : bf16 to vector<2x1x32xbf16>
      %c0_130 = arith.constant 0 : index
      %c0_131 = arith.constant 0 : index
      %c0_132 = arith.constant 0 : index
      %544 = vector.load %arg12[%c0_130, %c0_131, %c0_132] : memref<2x1x32xbf16, #tpu.memory_space<vmem>>, vector<2x1x32xbf16>
      tpu.vector_store %arg12[%c0_130, %c0_131, %c0_132], %543 {strides = array<i32>} : memref<2x1x32xbf16, #tpu.memory_space<vmem>>, vector<2x1x32xbf16>,
      %cst_133 = arith.constant 0.000000e+00 : f32
      %545 = vector.broadcast %cst_133 : f32 to vector<2x1x32xf32>
      %c0_134 = arith.constant 0 : index
      %c0_135 = arith.constant 0 : index
      %c0_136 = arith.constant 0 : index
      %546 = vector.load %arg13[%c0_134, %c0_135, %c0_136] : memref<2x1x32xf32, #tpu.memory_space<vmem>>, vector<2x1x32xf32>
      tpu.vector_store %arg13[%c0_134, %c0_135, %c0_136], %545 {strides = array<i32>} : memref<2x1x32xf32, #tpu.memory_space<vmem>>, vector<2x1x32xf32>,
    } else {
    }
    %c0 = arith.constant 0 : index
    %c0_1 = arith.constant 0 : index
    %c0_2 = arith.constant 0 : index
    %3 = vector.load %arg2[%c0, %c0_1, %c0_2] : memref<1x8x28xf32, #tpu.memory_space<vmem>>, vector<1x8x28xf32>
    %4 = vector.shape_cast %3 : vector<1x8x28xf32> to vector<8x28xf32>
    %5 = arith.truncf %4 : vector<8x28xf32> to vector<8x28xbf16>
    %c0_3 = arith.constant 0 : index
    %c0_4 = arith.constant 0 : index
    %6 = vector.load %arg3[%c0_3, %c0_4] : memref<28x128xbf16, #tpu.memory_space<vmem>>, vector<28x128xbf16>
    %cst = arith.constant dense<0.000000e+00> : vector<8x128xf32>
    %7 = tpu.matmul %5, %6, %cst {dimension_numbers = #tpu.dot_dimension_numbers<[1], [0], [0], [1], [0, 0, 1, 1], [], []>} : vector<8x28xbf16>, vector<28x128xbf16>, vector<8x128xf32> -> vector<8x128xf32>
    %c0_5 = arith.constant 0 : index
    %c0_6 = arith.constant 0 : index
    %8 = vector.load %arg4[%c0_5, %c0_6] : memref<1x128xf32, #tpu.memory_space<vmem>>, vector<1x128xf32>
    %9 = vector.broadcast %8 : vector<1x128xf32> to vector<8x128xf32>
    %10 = arith.addf %7, %9 : vector<8x128xf32>
    %11 = vector.shape_cast %10 : vector<8x128xf32> to vector<1x8x128xf32>
    %c0_7 = arith.constant 0 : index
    %c0_8 = arith.constant 0 : index
    %12 = vector.load %arg8[%c0_7, %c0_8] : memref<1x128xf32, #tpu.memory_space<vmem>>, vector<1x128xf32>
    %c0_9 = arith.constant 0 : index
    %c0_10 = arith.constant 0 : index
    %13 = vector.load %arg5[%c0_9, %c0_10] : memref<32x128xbf16, #tpu.memory_space<vmem>>, vector<32x128xbf16>
    %c0_11 = arith.constant 0 : index
    %c0_12 = arith.constant 0 : index
    %14 = vector.load %arg6[%c0_11, %c0_12] : memref<32x128xbf16, #tpu.memory_space<vmem>>, vector<32x128xbf16>
    %c0_13 = arith.constant 0 : index
    %c0_14 = arith.constant 0 : index
    %15 = vector.load %arg7[%c0_13, %c0_14] : memref<32x128xbf16, #tpu.memory_space<vmem>>, vector<32x128xbf16>
    %c0_15 = arith.constant 0 : index
    %c0_16 = arith.constant 0 : index
    %c0_17 = arith.constant 0 : index
    %16 = vector.load %arg12[%c0_15, %c0_16, %c0_17] : memref<2x1x32xbf16, #tpu.memory_space<vmem>>, vector<1x1x32xbf16>
    %17 = vector.shape_cast %16 : vector<1x1x32xbf16> to vector<1x32xbf16>
    %c0_18 = arith.constant 0 : index
    %c0_19 = arith.constant 0 : index
    %c0_20 = arith.constant 0 : index
    %18 = vector.load %arg13[%c0_18, %c0_19, %c0_20] : memref<2x1x32xf32, #tpu.memory_space<vmem>>, vector<1x1x32xf32>
    %19 = vector.shape_cast %18 : vector<1x1x32xf32> to vector<1x32xf32>
    %c1 = arith.constant 1 : index
    %c0_21 = arith.constant 0 : index
    %c0_22 = arith.constant 0 : index
    %20 = vector.load %arg12[%c1, %c0_21, %c0_22] : memref<2x1x32xbf16, #tpu.memory_space<vmem>>, vector<1x1x32xbf16>
    %21 = vector.shape_cast %20 : vector<1x1x32xbf16> to vector<1x32xbf16>
    %c1_23 = arith.constant 1 : index
    %c0_24 = arith.constant 0 : index
    %c0_25 = arith.constant 0 : index
    %22 = vector.load %arg13[%c1_23, %c0_24, %c0_25] : memref<2x1x32xf32, #tpu.memory_space<vmem>>, vector<1x1x32xf32>
    %23 = vector.shape_cast %22 : vector<1x1x32xf32> to vector<1x32xf32>
    %24 = vector.extract_strided_slice %11 {offsets = [0, 0, 0], sizes = [1, 1, 128], strides = [1, 1, 1]} : vector<1x8x128xf32> to vector<1x1x128xf32>
    %25 = vector.shape_cast %24 : vector<1x1x128xf32> to vector<1x128xf32>
    %cst_26 = arith.constant dense<0.000000e+00> : vector<1x128xf32>
    %26 = tpu.matmul %17, %13, %cst_26 {dimension_numbers = #tpu.dot_dimension_numbers<[1], [0], [0], [1], [0, 0, 1, 1], [], []>} : vector<1x32xbf16>, vector<32x128xbf16>, vector<1x128xf32> -> vector<1x128xf32>
    %27 = arith.addf %25, %26 : vector<1x128xf32>
    %28 = vector.extract_strided_slice %27 {offsets = [0, 0], sizes = [1, 32], strides = [1, 1]} : vector<1x128xf32> to vector<1x32xf32>
    %29 = arith.negf %28 : vector<1x32xf32>
    %30 = math.exp %29 : vector<1x32xf32>
    %cst_27 = arith.constant 1.000000e+00 : f32
    %31 = vector.broadcast %cst_27 : f32 to vector<1x32xf32>
    %32 = arith.addf %31, %30 : vector<1x32xf32>
    %33 = arith.divf %31, %32 : vector<1x32xf32>
    %34 = vector.extract_strided_slice %27 {offsets = [0, 32], sizes = [1, 32], strides = [1, 1]} : vector<1x128xf32> to vector<1x32xf32>
    %35 = arith.negf %34 : vector<1x32xf32>
    %36 = math.exp %35 : vector<1x32xf32>
    %cst_28 = arith.constant 1.000000e+00 : f32
    %37 = vector.broadcast %cst_28 : f32 to vector<1x32xf32>
    %38 = arith.addf %37, %36 : vector<1x32xf32>
    %39 = arith.divf %37, %38 : vector<1x32xf32>
    %40 = vector.extract_strided_slice %27 {offsets = [0, 64], sizes = [1, 32], strides = [1, 1]} : vector<1x128xf32> to vector<1x32xf32>
    %41 = math.tanh %40 : vector<1x32xf32>
    %42 = vector.extract_strided_slice %27 {offsets = [0, 96], sizes = [1, 32], strides = [1, 1]} : vector<1x128xf32> to vector<1x32xf32>
    %43 = arith.negf %42 : vector<1x32xf32>
    %44 = math.exp %43 : vector<1x32xf32>
    %cst_29 = arith.constant 1.000000e+00 : f32
    %45 = vector.broadcast %cst_29 : f32 to vector<1x32xf32>
    %46 = arith.addf %45, %44 : vector<1x32xf32>
    %47 = arith.divf %45, %46 : vector<1x32xf32>
    %48 = arith.mulf %39, %19 : vector<1x32xf32>
    %49 = arith.mulf %33, %41 : vector<1x32xf32>
    %50 = arith.addf %48, %49 : vector<1x32xf32>
    %51 = math.tanh %50 : vector<1x32xf32>
    %52 = arith.mulf %47, %51 : vector<1x32xf32>
    %53 = arith.truncf %52 : vector<1x32xf32> to vector<1x32xbf16>
    %cst_30 = arith.constant dense<0.000000e+00> : vector<1x128xf32>
    %54 = tpu.matmul %53, %14, %cst_30 {dimension_numbers = #tpu.dot_dimension_numbers<[1], [0], [0], [1], [0, 0, 1, 1], [], []>} : vector<1x32xbf16>, vector<32x128xbf16>, vector<1x128xf32> -> vector<1x128xf32>
    %cst_31 = arith.constant dense<0.000000e+00> : vector<1x128xf32>
    %55 = tpu.matmul %21, %15, %cst_31 {dimension_numbers = #tpu.dot_dimension_numbers<[1], [0], [0], [1], [0, 0, 1, 1], [], []>} : vector<1x32xbf16>, vector<32x128xbf16>, vector<1x128xf32> -> vector<1x128xf32>
    %56 = arith.addf %54, %55 : vector<1x128xf32>
    %57 = arith.addf %56, %12 : vector<1x128xf32>
    %58 = vector.extract_strided_slice %57 {offsets = [0, 0], sizes = [1, 32], strides = [1, 1]} : vector<1x128xf32> to vector<1x32xf32>
    %59 = arith.negf %58 : vector<1x32xf32>
    %60 = math.exp %59 : vector<1x32xf32>
    %cst_32 = arith.constant 1.000000e+00 : f32
    %61 = vector.broadcast %cst_32 : f32 to vector<1x32xf32>
    %62 = arith.addf %61, %60 : vector<1x32xf32>
    %63 = arith.divf %61, %62 : vector<1x32xf32>
    %64 = vector.extract_strided_slice %57 {offsets = [0, 32], sizes = [1, 32], strides = [1, 1]} : vector<1x128xf32> to vector<1x32xf32>
    %65 = arith.negf %64 : vector<1x32xf32>
    %66 = math.exp %65 : vector<1x32xf32>
    %cst_33 = arith.constant 1.000000e+00 : f32
    %67 = vector.broadcast %cst_33 : f32 to vector<1x32xf32>
    %68 = arith.addf %67, %66 : vector<1x32xf32>
    %69 = arith.divf %67, %68 : vector<1x32xf32>
    %70 = vector.extract_strided_slice %57 {offsets = [0, 64], sizes = [1, 32], strides = [1, 1]} : vector<1x128xf32> to vector<1x32xf32>
    %71 = math.tanh %70 : vector<1x32xf32>
    %72 = vector.extract_strided_slice %57 {offsets = [0, 96], sizes = [1, 32], strides = [1, 1]} : vector<1x128xf32> to vector<1x32xf32>
    %73 = arith.negf %72 : vector<1x32xf32>
    %74 = math.exp %73 : vector<1x32xf32>
    %cst_34 = arith.constant 1.000000e+00 : f32
    %75 = vector.broadcast %cst_34 : f32 to vector<1x32xf32>
    %76 = arith.addf %75, %74 : vector<1x32xf32>
    %77 = arith.divf %75, %76 : vector<1x32xf32>
    %78 = arith.mulf %69, %23 : vector<1x32xf32>
    %79 = arith.mulf %63, %71 : vector<1x32xf32>
    %80 = arith.addf %78, %79 : vector<1x32xf32>
    %81 = math.tanh %80 : vector<1x32xf32>
    %82 = arith.mulf %77, %81 : vector<1x32xf32>
    %83 = arith.truncf %82 : vector<1x32xf32> to vector<1x32xbf16>
    %c0_35 = arith.constant 0 : index
    %c0_36 = arith.constant 0 : index
    %c0_37 = arith.constant 0 : index
    %84 = vector.load %arg9[%c0_35, %c0_36, %c0_37] : memref<1x8x32xbf16, #tpu.memory_space<vmem>>, vector<1x1x32xbf16>
    %85 = vector.shape_cast %84 : vector<1x1x32xbf16> to vector<1x32xbf16>
    %86 = vector.shape_cast %83 : vector<1x32xbf16> to vector<1x1x32xbf16>
    tpu.vector_store %arg9[%c0_35, %c0_36, %c0_37], %86 {strides = array<i32>} : memref<1x8x32xbf16, #tpu.memory_space<vmem>>, vector<1x1x32xbf16>,
    %87 = vector.extract_strided_slice %11 {offsets = [0, 1, 0], sizes = [1, 1, 128], strides = [1, 1, 1]} : vector<1x8x128xf32> to vector<1x1x128xf32>
    %88 = vector.shape_cast %87 : vector<1x1x128xf32> to vector<1x128xf32>
    %cst_38 = arith.constant dense<0.000000e+00> : vector<1x128xf32>
    %89 = tpu.matmul %53, %13, %cst_38 {dimension_numbers = #tpu.dot_dimension_numbers<[1], [0], [0], [1], [0, 0, 1, 1], [], []>} : vector<1x32xbf16>, vector<32x128xbf16>, vector<1x128xf32> -> vector<1x128xf32>
    %90 = arith.addf %88, %89 : vector<1x128xf32>
    %91 = vector.extract_strided_slice %90 {offsets = [0, 0], sizes = [1, 32], strides = [1, 1]} : vector<1x128xf32> to vector<1x32xf32>
    %92 = arith.negf %91 : vector<1x32xf32>
    %93 = math.exp %92 : vector<1x32xf32>
    %cst_39 = arith.constant 1.000000e+00 : f32
    %94 = vector.broadcast %cst_39 : f32 to vector<1x32xf32>
    %95 = arith.addf %94, %93 : vector<1x32xf32>
    %96 = arith.divf %94, %95 : vector<1x32xf32>
    %97 = vector.extract_strided_slice %90 {offsets = [0, 32], sizes = [1, 32], strides = [1, 1]} : vector<1x128xf32> to vector<1x32xf32>
    %98 = arith.negf %97 : vector<1x32xf32>
    %99 = math.exp %98 : vector<1x32xf32>
    %cst_40 = arith.constant 1.000000e+00 : f32
    %100 = vector.broadcast %cst_40 : f32 to vector<1x32xf32>
    %101 = arith.addf %100, %99 : vector<1x32xf32>
    %102 = arith.divf %100, %101 : vector<1x32xf32>
    %103 = vector.extract_strided_slice %90 {offsets = [0, 64], sizes = [1, 32], strides = [1, 1]} : vector<1x128xf32> to vector<1x32xf32>
    %104 = math.tanh %103 : vector<1x32xf32>
    %105 = vector.extract_strided_slice %90 {offsets = [0, 96], sizes = [1, 32], strides = [1, 1]} : vector<1x128xf32> to vector<1x32xf32>
    %106 = arith.negf %105 : vector<1x32xf32>
    %107 = math.exp %106 : vector<1x32xf32>
    %cst_41 = arith.constant 1.000000e+00 : f32
    %108 = vector.broadcast %cst_41 : f32 to vector<1x32xf32>
    %109 = arith.addf %108, %107 : vector<1x32xf32>
    %110 = arith.divf %108, %109 : vector<1x32xf32>
    %111 = arith.mulf %102, %50 : vector<1x32xf32>
    %112 = arith.mulf %96, %104 : vector<1x32xf32>
    %113 = arith.addf %111, %112 : vector<1x32xf32>
    %114 = math.tanh %113 : vector<1x32xf32>
    %115 = arith.mulf %110, %114 : vector<1x32xf32>
    %116 = arith.truncf %115 : vector<1x32xf32> to vector<1x32xbf16>
    %cst_42 = arith.constant dense<0.000000e+00> : vector<1x128xf32>
    %117 = tpu.matmul %116, %14, %cst_42 {dimension_numbers = #tpu.dot_dimension_numbers<[1], [0], [0], [1], [0, 0, 1, 1], [], []>} : vector<1x32xbf16>, vector<32x128xbf16>, vector<1x128xf32> -> vector<1x128xf32>
    %cst_43 = arith.constant dense<0.000000e+00> : vector<1x128xf32>
    %118 = tpu.matmul %83, %15, %cst_43 {dimension_numbers = #tpu.dot_dimension_numbers<[1], [0], [0], [1], [0, 0, 1, 1], [], []>} : vector<1x32xbf16>, vector<32x128xbf16>, vector<1x128xf32> -> vector<1x128xf32>
    %119 = arith.addf %117, %118 : vector<1x128xf32>
    %120 = arith.addf %119, %12 : vector<1x128xf32>
    %121 = vector.extract_strided_slice %120 {offsets = [0, 0], sizes = [1, 32], strides = [1, 1]} : vector<1x128xf32> to vector<1x32xf32>
    %122 = arith.negf %121 : vector<1x32xf32>
    %123 = math.exp %122 : vector<1x32xf32>
    %cst_44 = arith.constant 1.000000e+00 : f32
    %124 = vector.broadcast %cst_44 : f32 to vector<1x32xf32>
    %125 = arith.addf %124, %123 : vector<1x32xf32>
    %126 = arith.divf %124, %125 : vector<1x32xf32>
    %127 = vector.extract_strided_slice %120 {offsets = [0, 32], sizes = [1, 32], strides = [1, 1]} : vector<1x128xf32> to vector<1x32xf32>
    %128 = arith.negf %127 : vector<1x32xf32>
    %129 = math.exp %128 : vector<1x32xf32>
    %cst_45 = arith.constant 1.000000e+00 : f32
    %130 = vector.broadcast %cst_45 : f32 to vector<1x32xf32>
    %131 = arith.addf %130, %129 : vector<1x32xf32>
    %132 = arith.divf %130, %131 : vector<1x32xf32>
    %133 = vector.extract_strided_slice %120 {offsets = [0, 64], sizes = [1, 32], strides = [1, 1]} : vector<1x128xf32> to vector<1x32xf32>
    %134 = math.tanh %133 : vector<1x32xf32>
    %135 = vector.extract_strided_slice %120 {offsets = [0, 96], sizes = [1, 32], strides = [1, 1]} : vector<1x128xf32> to vector<1x32xf32>
    %136 = arith.negf %135 : vector<1x32xf32>
    %137 = math.exp %136 : vector<1x32xf32>
    %cst_46 = arith.constant 1.000000e+00 : f32
    %138 = vector.broadcast %cst_46 : f32 to vector<1x32xf32>
    %139 = arith.addf %138, %137 : vector<1x32xf32>
    %140 = arith.divf %138, %139 : vector<1x32xf32>
    %141 = arith.mulf %132, %80 : vector<1x32xf32>
    %142 = arith.mulf %126, %134 : vector<1x32xf32>
    %143 = arith.addf %141, %142 : vector<1x32xf32>
    %144 = math.tanh %143 : vector<1x32xf32>
    %145 = arith.mulf %140, %144 : vector<1x32xf32>
    %146 = arith.truncf %145 : vector<1x32xf32> to vector<1x32xbf16>
    %c0_47 = arith.constant 0 : index
    %c1_48 = arith.constant 1 : index
    %c0_49 = arith.constant 0 : index
    %147 = vector.load %arg9[%c0_47, %c1_48, %c0_49] : memref<1x8x32xbf16, #tpu.memory_space<vmem>>, vector<1x1x32xbf16>
    %148 = vector.shape_cast %147 : vector<1x1x32xbf16> to vector<1x32xbf16>
    %149 = vector.shape_cast %146 : vector<1x32xbf16> to vector<1x1x32xbf16>
    tpu.vector_store %arg9[%c0_47, %c1_48, %c0_49], %149 {strides = array<i32>} : memref<1x8x32xbf16, #tpu.memory_space<vmem>>, vector<1x1x32xbf16>,
    %150 = vector.extract_strided_slice %11 {offsets = [0, 2, 0], sizes = [1, 1, 128], strides = [1, 1, 1]} : vector<1x8x128xf32> to vector<1x1x128xf32>
    %151 = vector.shape_cast %150 : vector<1x1x128xf32> to vector<1x128xf32>
    %cst_50 = arith.constant dense<0.000000e+00> : vector<1x128xf32>
    %152 = tpu.matmul %116, %13, %cst_50 {dimension_numbers = #tpu.dot_dimension_numbers<[1], [0], [0], [1], [0, 0, 1, 1], [], []>} : vector<1x32xbf16>, vector<32x128xbf16>, vector<1x128xf32> -> vector<1x128xf32>
    %153 = arith.addf %151, %152 : vector<1x128xf32>
    %154 = vector.extract_strided_slice %153 {offsets = [0, 0], sizes = [1, 32], strides = [1, 1]} : vector<1x128xf32> to vector<1x32xf32>
    %155 = arith.negf %154 : vector<1x32xf32>
    %156 = math.exp %155 : vector<1x32xf32>
    %cst_51 = arith.constant 1.000000e+00 : f32
    %157 = vector.broadcast %cst_51 : f32 to vector<1x32xf32>
    %158 = arith.addf %157, %156 : vector<1x32xf32>
    %159 = arith.divf %157, %158 : vector<1x32xf32>
    %160 = vector.extract_strided_slice %153 {offsets = [0, 32], sizes = [1, 32], strides = [1, 1]} : vector<1x128xf32> to vector<1x32xf32>
    %161 = arith.negf %160 : vector<1x32xf32>
    %162 = math.exp %161 : vector<1x32xf32>
    %cst_52 = arith.constant 1.000000e+00 : f32
    %163 = vector.broadcast %cst_52 : f32 to vector<1x32xf32>
    %164 = arith.addf %163, %162 : vector<1x32xf32>
    %165 = arith.divf %163, %164 : vector<1x32xf32>
    %166 = vector.extract_strided_slice %153 {offsets = [0, 64], sizes = [1, 32], strides = [1, 1]} : vector<1x128xf32> to vector<1x32xf32>
    %167 = math.tanh %166 : vector<1x32xf32>
    %168 = vector.extract_strided_slice %153 {offsets = [0, 96], sizes = [1, 32], strides = [1, 1]} : vector<1x128xf32> to vector<1x32xf32>
    %169 = arith.negf %168 : vector<1x32xf32>
    %170 = math.exp %169 : vector<1x32xf32>
    %cst_53 = arith.constant 1.000000e+00 : f32
    %171 = vector.broadcast %cst_53 : f32 to vector<1x32xf32>
    %172 = arith.addf %171, %170 : vector<1x32xf32>
    %173 = arith.divf %171, %172 : vector<1x32xf32>
    %174 = arith.mulf %165, %113 : vector<1x32xf32>
    %175 = arith.mulf %159, %167 : vector<1x32xf32>
    %176 = arith.addf %174, %175 : vector<1x32xf32>
    %177 = math.tanh %176 : vector<1x32xf32>
    %178 = arith.mulf %173, %177 : vector<1x32xf32>
    %179 = arith.truncf %178 : vector<1x32xf32> to vector<1x32xbf16>
    %cst_54 = arith.constant dense<0.000000e+00> : vector<1x128xf32>
    %180 = tpu.matmul %179, %14, %cst_54 {dimension_numbers = #tpu.dot_dimension_numbers<[1], [0], [0], [1], [0, 0, 1, 1], [], []>} : vector<1x32xbf16>, vector<32x128xbf16>, vector<1x128xf32> -> vector<1x128xf32>
    %cst_55 = arith.constant dense<0.000000e+00> : vector<1x128xf32>
    %181 = tpu.matmul %146, %15, %cst_55 {dimension_numbers = #tpu.dot_dimension_numbers<[1], [0], [0], [1], [0, 0, 1, 1], [], []>} : vector<1x32xbf16>, vector<32x128xbf16>, vector<1x128xf32> -> vector<1x128xf32>
    %182 = arith.addf %180, %181 : vector<1x128xf32>
    %183 = arith.addf %182, %12 : vector<1x128xf32>
    %184 = vector.extract_strided_slice %183 {offsets = [0, 0], sizes = [1, 32], strides = [1, 1]} : vector<1x128xf32> to vector<1x32xf32>
    %185 = arith.negf %184 : vector<1x32xf32>
    %186 = math.exp %185 : vector<1x32xf32>
    %cst_56 = arith.constant 1.000000e+00 : f32
    %187 = vector.broadcast %cst_56 : f32 to vector<1x32xf32>
    %188 = arith.addf %187, %186 : vector<1x32xf32>
    %189 = arith.divf %187, %188 : vector<1x32xf32>
    %190 = vector.extract_strided_slice %183 {offsets = [0, 32], sizes = [1, 32], strides = [1, 1]} : vector<1x128xf32> to vector<1x32xf32>
    %191 = arith.negf %190 : vector<1x32xf32>
    %192 = math.exp %191 : vector<1x32xf32>
    %cst_57 = arith.constant 1.000000e+00 : f32
    %193 = vector.broadcast %cst_57 : f32 to vector<1x32xf32>
    %194 = arith.addf %193, %192 : vector<1x32xf32>
    %195 = arith.divf %193, %194 : vector<1x32xf32>
    %196 = vector.extract_strided_slice %183 {offsets = [0, 64], sizes = [1, 32], strides = [1, 1]} : vector<1x128xf32> to vector<1x32xf32>
    %197 = math.tanh %196 : vector<1x32xf32>
    %198 = vector.extract_strided_slice %183 {offsets = [0, 96], sizes = [1, 32], strides = [1, 1]} : vector<1x128xf32> to vector<1x32xf32>
    %199 = arith.negf %198 : vector<1x32xf32>
    %200 = math.exp %199 : vector<1x32xf32>
    %cst_58 = arith.constant 1.000000e+00 : f32
    %201 = vector.broadcast %cst_58 : f32 to vector<1x32xf32>
    %202 = arith.addf %201, %200 : vector<1x32xf32>
    %203 = arith.divf %201, %202 : vector<1x32xf32>
    %204 = arith.mulf %195, %143 : vector<1x32xf32>
    %205 = arith.mulf %189, %197 : vector<1x32xf32>
    %206 = arith.addf %204, %205 : vector<1x32xf32>
    %207 = math.tanh %206 : vector<1x32xf32>
    %208 = arith.mulf %203, %207 : vector<1x32xf32>
    %209 = arith.truncf %208 : vector<1x32xf32> to vector<1x32xbf16>
    %c0_59 = arith.constant 0 : index
    %c2 = arith.constant 2 : index
    %c0_60 = arith.constant 0 : index
    %210 = vector.load %arg9[%c0_59, %c2, %c0_60] : memref<1x8x32xbf16, #tpu.memory_space<vmem>>, vector<1x1x32xbf16>
    %211 = vector.shape_cast %210 : vector<1x1x32xbf16> to vector<1x32xbf16>
    %212 = vector.shape_cast %209 : vector<1x32xbf16> to vector<1x1x32xbf16>
    tpu.vector_store %arg9[%c0_59, %c2, %c0_60], %212 {strides = array<i32>} : memref<1x8x32xbf16, #tpu.memory_space<vmem>>, vector<1x1x32xbf16>,
    %213 = vector.extract_strided_slice %11 {offsets = [0, 3, 0], sizes = [1, 1, 128], strides = [1, 1, 1]} : vector<1x8x128xf32> to vector<1x1x128xf32>
    %214 = vector.shape_cast %213 : vector<1x1x128xf32> to vector<1x128xf32>
    %cst_61 = arith.constant dense<0.000000e+00> : vector<1x128xf32>
    %215 = tpu.matmul %179, %13, %cst_61 {dimension_numbers = #tpu.dot_dimension_numbers<[1], [0], [0], [1], [0, 0, 1, 1], [], []>} : vector<1x32xbf16>, vector<32x128xbf16>, vector<1x128xf32> -> vector<1x128xf32>
    %216 = arith.addf %214, %215 : vector<1x128xf32>
    %217 = vector.extract_strided_slice %216 {offsets = [0, 0], sizes = [1, 32], strides = [1, 1]} : vector<1x128xf32> to vector<1x32xf32>
    %218 = arith.negf %217 : vector<1x32xf32>
    %219 = math.exp %218 : vector<1x32xf32>
    %cst_62 = arith.constant 1.000000e+00 : f32
    %220 = vector.broadcast %cst_62 : f32 to vector<1x32xf32>
    %221 = arith.addf %220, %219 : vector<1x32xf32>
    %222 = arith.divf %220, %221 : vector<1x32xf32>
    %223 = vector.extract_strided_slice %216 {offsets = [0, 32], sizes = [1, 32], strides = [1, 1]} : vector<1x128xf32> to vector<1x32xf32>
    %224 = arith.negf %223 : vector<1x32xf32>
    %225 = math.exp %224 : vector<1x32xf32>
    %cst_63 = arith.constant 1.000000e+00 : f32
    %226 = vector.broadcast %cst_63 : f32 to vector<1x32xf32>
    %227 = arith.addf %226, %225 : vector<1x32xf32>
    %228 = arith.divf %226, %227 : vector<1x32xf32>
    %229 = vector.extract_strided_slice %216 {offsets = [0, 64], sizes = [1, 32], strides = [1, 1]} : vector<1x128xf32> to vector<1x32xf32>
    %230 = math.tanh %229 : vector<1x32xf32>
    %231 = vector.extract_strided_slice %216 {offsets = [0, 96], sizes = [1, 32], strides = [1, 1]} : vector<1x128xf32> to vector<1x32xf32>
    %232 = arith.negf %231 : vector<1x32xf32>
    %233 = math.exp %232 : vector<1x32xf32>
    %cst_64 = arith.constant 1.000000e+00 : f32
    %234 = vector.broadcast %cst_64 : f32 to vector<1x32xf32>
    %235 = arith.addf %234, %233 : vector<1x32xf32>
    %236 = arith.divf %234, %235 : vector<1x32xf32>
    %237 = arith.mulf %228, %176 : vector<1x32xf32>
    %238 = arith.mulf %222, %230 : vector<1x32xf32>
    %239 = arith.addf %237, %238 : vector<1x32xf32>
    %240 = math.tanh %239 : vector<1x32xf32>
    %241 = arith.mulf %236, %240 : vector<1x32xf32>
    %242 = arith.truncf %241 : vector<1x32xf32> to vector<1x32xbf16>
    %cst_65 = arith.constant dense<0.000000e+00> : vector<1x128xf32>
    %243 = tpu.matmul %242, %14, %cst_65 {dimension_numbers = #tpu.dot_dimension_numbers<[1], [0], [0], [1], [0, 0, 1, 1], [], []>} : vector<1x32xbf16>, vector<32x128xbf16>, vector<1x128xf32> -> vector<1x128xf32>
    %cst_66 = arith.constant dense<0.000000e+00> : vector<1x128xf32>
    %244 = tpu.matmul %209, %15, %cst_66 {dimension_numbers = #tpu.dot_dimension_numbers<[1], [0], [0], [1], [0, 0, 1, 1], [], []>} : vector<1x32xbf16>, vector<32x128xbf16>, vector<1x128xf32> -> vector<1x128xf32>
    %245 = arith.addf %243, %244 : vector<1x128xf32>
    %246 = arith.addf %245, %12 : vector<1x128xf32>
    %247 = vector.extract_strided_slice %246 {offsets = [0, 0], sizes = [1, 32], strides = [1, 1]} : vector<1x128xf32> to vector<1x32xf32>
    %248 = arith.negf %247 : vector<1x32xf32>
    %249 = math.exp %248 : vector<1x32xf32>
    %cst_67 = arith.constant 1.000000e+00 : f32
    %250 = vector.broadcast %cst_67 : f32 to vector<1x32xf32>
    %251 = arith.addf %250, %249 : vector<1x32xf32>
    %252 = arith.divf %250, %251 : vector<1x32xf32>
    %253 = vector.extract_strided_slice %246 {offsets = [0, 32], sizes = [1, 32], strides = [1, 1]} : vector<1x128xf32> to vector<1x32xf32>
    %254 = arith.negf %253 : vector<1x32xf32>
    %255 = math.exp %254 : vector<1x32xf32>
    %cst_68 = arith.constant 1.000000e+00 : f32
    %256 = vector.broadcast %cst_68 : f32 to vector<1x32xf32>
    %257 = arith.addf %256, %255 : vector<1x32xf32>
    %258 = arith.divf %256, %257 : vector<1x32xf32>
    %259 = vector.extract_strided_slice %246 {offsets = [0, 64], sizes = [1, 32], strides = [1, 1]} : vector<1x128xf32> to vector<1x32xf32>
    %260 = math.tanh %259 : vector<1x32xf32>
    %261 = vector.extract_strided_slice %246 {offsets = [0, 96], sizes = [1, 32], strides = [1, 1]} : vector<1x128xf32> to vector<1x32xf32>
    %262 = arith.negf %261 : vector<1x32xf32>
    %263 = math.exp %262 : vector<1x32xf32>
    %cst_69 = arith.constant 1.000000e+00 : f32
    %264 = vector.broadcast %cst_69 : f32 to vector<1x32xf32>
    %265 = arith.addf %264, %263 : vector<1x32xf32>
    %266 = arith.divf %264, %265 : vector<1x32xf32>
    %267 = arith.mulf %258, %206 : vector<1x32xf32>
    %268 = arith.mulf %252, %260 : vector<1x32xf32>
    %269 = arith.addf %267, %268 : vector<1x32xf32>
    %270 = math.tanh %269 : vector<1x32xf32>
    %271 = arith.mulf %266, %270 : vector<1x32xf32>
    %272 = arith.truncf %271 : vector<1x32xf32> to vector<1x32xbf16>
    %c0_70 = arith.constant 0 : index
    %c3 = arith.constant 3 : index
    %c0_71 = arith.constant 0 : index
    %273 = vector.load %arg9[%c0_70, %c3, %c0_71] : memref<1x8x32xbf16, #tpu.memory_space<vmem>>, vector<1x1x32xbf16>
    %274 = vector.shape_cast %273 : vector<1x1x32xbf16> to vector<1x32xbf16>
    %275 = vector.shape_cast %272 : vector<1x32xbf16> to vector<1x1x32xbf16>
    tpu.vector_store %arg9[%c0_70, %c3, %c0_71], %275 {strides = array<i32>} : memref<1x8x32xbf16, #tpu.memory_space<vmem>>, vector<1x1x32xbf16>,
    %276 = vector.extract_strided_slice %11 {offsets = [0, 4, 0], sizes = [1, 1, 128], strides = [1, 1, 1]} : vector<1x8x128xf32> to vector<1x1x128xf32>
    %277 = vector.shape_cast %276 : vector<1x1x128xf32> to vector<1x128xf32>
    %cst_72 = arith.constant dense<0.000000e+00> : vector<1x128xf32>
    %278 = tpu.matmul %242, %13, %cst_72 {dimension_numbers = #tpu.dot_dimension_numbers<[1], [0], [0], [1], [0, 0, 1, 1], [], []>} : vector<1x32xbf16>, vector<32x128xbf16>, vector<1x128xf32> -> vector<1x128xf32>
    %279 = arith.addf %277, %278 : vector<1x128xf32>
    %280 = vector.extract_strided_slice %279 {offsets = [0, 0], sizes = [1, 32], strides = [1, 1]} : vector<1x128xf32> to vector<1x32xf32>
    %281 = arith.negf %280 : vector<1x32xf32>
    %282 = math.exp %281 : vector<1x32xf32>
    %cst_73 = arith.constant 1.000000e+00 : f32
    %283 = vector.broadcast %cst_73 : f32 to vector<1x32xf32>
    %284 = arith.addf %283, %282 : vector<1x32xf32>
    %285 = arith.divf %283, %284 : vector<1x32xf32>
    %286 = vector.extract_strided_slice %279 {offsets = [0, 32], sizes = [1, 32], strides = [1, 1]} : vector<1x128xf32> to vector<1x32xf32>
    %287 = arith.negf %286 : vector<1x32xf32>
    %288 = math.exp %287 : vector<1x32xf32>
    %cst_74 = arith.constant 1.000000e+00 : f32
    %289 = vector.broadcast %cst_74 : f32 to vector<1x32xf32>
    %290 = arith.addf %289, %288 : vector<1x32xf32>
    %291 = arith.divf %289, %290 : vector<1x32xf32>
    %292 = vector.extract_strided_slice %279 {offsets = [0, 64], sizes = [1, 32], strides = [1, 1]} : vector<1x128xf32> to vector<1x32xf32>
    %293 = math.tanh %292 : vector<1x32xf32>
    %294 = vector.extract_strided_slice %279 {offsets = [0, 96], sizes = [1, 32], strides = [1, 1]} : vector<1x128xf32> to vector<1x32xf32>
    %295 = arith.negf %294 : vector<1x32xf32>
    %296 = math.exp %295 : vector<1x32xf32>
    %cst_75 = arith.constant 1.000000e+00 : f32
    %297 = vector.broadcast %cst_75 : f32 to vector<1x32xf32>
    %298 = arith.addf %297, %296 : vector<1x32xf32>
    %299 = arith.divf %297, %298 : vector<1x32xf32>
    %300 = arith.mulf %291, %239 : vector<1x32xf32>
    %301 = arith.mulf %285, %293 : vector<1x32xf32>
    %302 = arith.addf %300, %301 : vector<1x32xf32>
    %303 = math.tanh %302 : vector<1x32xf32>
    %304 = arith.mulf %299, %303 : vector<1x32xf32>
    %305 = arith.truncf %304 : vector<1x32xf32> to vector<1x32xbf16>
    %cst_76 = arith.constant dense<0.000000e+00> : vector<1x128xf32>
    %306 = tpu.matmul %305, %14, %cst_76 {dimension_numbers = #tpu.dot_dimension_numbers<[1], [0], [0], [1], [0, 0, 1, 1], [], []>} : vector<1x32xbf16>, vector<32x128xbf16>, vector<1x128xf32> -> vector<1x128xf32>
    %cst_77 = arith.constant dense<0.000000e+00> : vector<1x128xf32>
    %307 = tpu.matmul %272, %15, %cst_77 {dimension_numbers = #tpu.dot_dimension_numbers<[1], [0], [0], [1], [0, 0, 1, 1], [], []>} : vector<1x32xbf16>, vector<32x128xbf16>, vector<1x128xf32> -> vector<1x128xf32>
    %308 = arith.addf %306, %307 : vector<1x128xf32>
    %309 = arith.addf %308, %12 : vector<1x128xf32>
    %310 = vector.extract_strided_slice %309 {offsets = [0, 0], sizes = [1, 32], strides = [1, 1]} : vector<1x128xf32> to vector<1x32xf32>
    %311 = arith.negf %310 : vector<1x32xf32>
    %312 = math.exp %311 : vector<1x32xf32>
    %cst_78 = arith.constant 1.000000e+00 : f32
    %313 = vector.broadcast %cst_78 : f32 to vector<1x32xf32>
    %314 = arith.addf %313, %312 : vector<1x32xf32>
    %315 = arith.divf %313, %314 : vector<1x32xf32>
    %316 = vector.extract_strided_slice %309 {offsets = [0, 32], sizes = [1, 32], strides = [1, 1]} : vector<1x128xf32> to vector<1x32xf32>
    %317 = arith.negf %316 : vector<1x32xf32>
    %318 = math.exp %317 : vector<1x32xf32>
    %cst_79 = arith.constant 1.000000e+00 : f32
    %319 = vector.broadcast %cst_79 : f32 to vector<1x32xf32>
    %320 = arith.addf %319, %318 : vector<1x32xf32>
    %321 = arith.divf %319, %320 : vector<1x32xf32>
    %322 = vector.extract_strided_slice %309 {offsets = [0, 64], sizes = [1, 32], strides = [1, 1]} : vector<1x128xf32> to vector<1x32xf32>
    %323 = math.tanh %322 : vector<1x32xf32>
    %324 = vector.extract_strided_slice %309 {offsets = [0, 96], sizes = [1, 32], strides = [1, 1]} : vector<1x128xf32> to vector<1x32xf32>
    %325 = arith.negf %324 : vector<1x32xf32>
    %326 = math.exp %325 : vector<1x32xf32>
    %cst_80 = arith.constant 1.000000e+00 : f32
    %327 = vector.broadcast %cst_80 : f32 to vector<1x32xf32>
    %328 = arith.addf %327, %326 : vector<1x32xf32>
    %329 = arith.divf %327, %328 : vector<1x32xf32>
    %330 = arith.mulf %321, %269 : vector<1x32xf32>
    %331 = arith.mulf %315, %323 : vector<1x32xf32>
    %332 = arith.addf %330, %331 : vector<1x32xf32>
    %333 = math.tanh %332 : vector<1x32xf32>
    %334 = arith.mulf %329, %333 : vector<1x32xf32>
    %335 = arith.truncf %334 : vector<1x32xf32> to vector<1x32xbf16>
    %c0_81 = arith.constant 0 : index
    %c4 = arith.constant 4 : index
    %c0_82 = arith.constant 0 : index
    %336 = vector.load %arg9[%c0_81, %c4, %c0_82] : memref<1x8x32xbf16, #tpu.memory_space<vmem>>, vector<1x1x32xbf16>
    %337 = vector.shape_cast %336 : vector<1x1x32xbf16> to vector<1x32xbf16>
    %338 = vector.shape_cast %335 : vector<1x32xbf16> to vector<1x1x32xbf16>
    tpu.vector_store %arg9[%c0_81, %c4, %c0_82], %338 {strides = array<i32>} : memref<1x8x32xbf16, #tpu.memory_space<vmem>>, vector<1x1x32xbf16>,
    %339 = vector.extract_strided_slice %11 {offsets = [0, 5, 0], sizes = [1, 1, 128], strides = [1, 1, 1]} : vector<1x8x128xf32> to vector<1x1x128xf32>
    %340 = vector.shape_cast %339 : vector<1x1x128xf32> to vector<1x128xf32>
    %cst_83 = arith.constant dense<0.000000e+00> : vector<1x128xf32>
    %341 = tpu.matmul %305, %13, %cst_83 {dimension_numbers = #tpu.dot_dimension_numbers<[1], [0], [0], [1], [0, 0, 1, 1], [], []>} : vector<1x32xbf16>, vector<32x128xbf16>, vector<1x128xf32> -> vector<1x128xf32>
    %342 = arith.addf %340, %341 : vector<1x128xf32>
    %343 = vector.extract_strided_slice %342 {offsets = [0, 0], sizes = [1, 32], strides = [1, 1]} : vector<1x128xf32> to vector<1x32xf32>
    %344 = arith.negf %343 : vector<1x32xf32>
    %345 = math.exp %344 : vector<1x32xf32>
    %cst_84 = arith.constant 1.000000e+00 : f32
    %346 = vector.broadcast %cst_84 : f32 to vector<1x32xf32>
    %347 = arith.addf %346, %345 : vector<1x32xf32>
    %348 = arith.divf %346, %347 : vector<1x32xf32>
    %349 = vector.extract_strided_slice %342 {offsets = [0, 32], sizes = [1, 32], strides = [1, 1]} : vector<1x128xf32> to vector<1x32xf32>
    %350 = arith.negf %349 : vector<1x32xf32>
    %351 = math.exp %350 : vector<1x32xf32>
    %cst_85 = arith.constant 1.000000e+00 : f32
    %352 = vector.broadcast %cst_85 : f32 to vector<1x32xf32>
    %353 = arith.addf %352, %351 : vector<1x32xf32>
    %354 = arith.divf %352, %353 : vector<1x32xf32>
    %355 = vector.extract_strided_slice %342 {offsets = [0, 64], sizes = [1, 32], strides = [1, 1]} : vector<1x128xf32> to vector<1x32xf32>
    %356 = math.tanh %355 : vector<1x32xf32>
    %357 = vector.extract_strided_slice %342 {offsets = [0, 96], sizes = [1, 32], strides = [1, 1]} : vector<1x128xf32> to vector<1x32xf32>
    %358 = arith.negf %357 : vector<1x32xf32>
    %359 = math.exp %358 : vector<1x32xf32>
    %cst_86 = arith.constant 1.000000e+00 : f32
    %360 = vector.broadcast %cst_86 : f32 to vector<1x32xf32>
    %361 = arith.addf %360, %359 : vector<1x32xf32>
    %362 = arith.divf %360, %361 : vector<1x32xf32>
    %363 = arith.mulf %354, %302 : vector<1x32xf32>
    %364 = arith.mulf %348, %356 : vector<1x32xf32>
    %365 = arith.addf %363, %364 : vector<1x32xf32>
    %366 = math.tanh %365 : vector<1x32xf32>
    %367 = arith.mulf %362, %366 : vector<1x32xf32>
    %368 = arith.truncf %367 : vector<1x32xf32> to vector<1x32xbf16>
    %cst_87 = arith.constant dense<0.000000e+00> : vector<1x128xf32>
    %369 = tpu.matmul %368, %14, %cst_87 {dimension_numbers = #tpu.dot_dimension_numbers<[1], [0], [0], [1], [0, 0, 1, 1], [], []>} : vector<1x32xbf16>, vector<32x128xbf16>, vector<1x128xf32> -> vector<1x128xf32>
    %cst_88 = arith.constant dense<0.000000e+00> : vector<1x128xf32>
    %370 = tpu.matmul %335, %15, %cst_88 {dimension_numbers = #tpu.dot_dimension_numbers<[1], [0], [0], [1], [0, 0, 1, 1], [], []>} : vector<1x32xbf16>, vector<32x128xbf16>, vector<1x128xf32> -> vector<1x128xf32>
    %371 = arith.addf %369, %370 : vector<1x128xf32>
    %372 = arith.addf %371, %12 : vector<1x128xf32>
    %373 = vector.extract_strided_slice %372 {offsets = [0, 0], sizes = [1, 32], strides = [1, 1]} : vector<1x128xf32> to vector<1x32xf32>
    %374 = arith.negf %373 : vector<1x32xf32>
    %375 = math.exp %374 : vector<1x32xf32>
    %cst_89 = arith.constant 1.000000e+00 : f32
    %376 = vector.broadcast %cst_89 : f32 to vector<1x32xf32>
    %377 = arith.addf %376, %375 : vector<1x32xf32>
    %378 = arith.divf %376, %377 : vector<1x32xf32>
    %379 = vector.extract_strided_slice %372 {offsets = [0, 32], sizes = [1, 32], strides = [1, 1]} : vector<1x128xf32> to vector<1x32xf32>
    %380 = arith.negf %379 : vector<1x32xf32>
    %381 = math.exp %380 : vector<1x32xf32>
    %cst_90 = arith.constant 1.000000e+00 : f32
    %382 = vector.broadcast %cst_90 : f32 to vector<1x32xf32>
    %383 = arith.addf %382, %381 : vector<1x32xf32>
    %384 = arith.divf %382, %383 : vector<1x32xf32>
    %385 = vector.extract_strided_slice %372 {offsets = [0, 64], sizes = [1, 32], strides = [1, 1]} : vector<1x128xf32> to vector<1x32xf32>
    %386 = math.tanh %385 : vector<1x32xf32>
    %387 = vector.extract_strided_slice %372 {offsets = [0, 96], sizes = [1, 32], strides = [1, 1]} : vector<1x128xf32> to vector<1x32xf32>
    %388 = arith.negf %387 : vector<1x32xf32>
    %389 = math.exp %388 : vector<1x32xf32>
    %cst_91 = arith.constant 1.000000e+00 : f32
    %390 = vector.broadcast %cst_91 : f32 to vector<1x32xf32>
    %391 = arith.addf %390, %389 : vector<1x32xf32>
    %392 = arith.divf %390, %391 : vector<1x32xf32>
    %393 = arith.mulf %384, %332 : vector<1x32xf32>
    %394 = arith.mulf %378, %386 : vector<1x32xf32>
    %395 = arith.addf %393, %394 : vector<1x32xf32>
    %396 = math.tanh %395 : vector<1x32xf32>
    %397 = arith.mulf %392, %396 : vector<1x32xf32>
    %398 = arith.truncf %397 : vector<1x32xf32> to vector<1x32xbf16>
    %c0_92 = arith.constant 0 : index
    %c5 = arith.constant 5 : index
    %c0_93 = arith.constant 0 : index
    %399 = vector.load %arg9[%c0_92, %c5, %c0_93] : memref<1x8x32xbf16, #tpu.memory_space<vmem>>, vector<1x1x32xbf16>
    %400 = vector.shape_cast %399 : vector<1x1x32xbf16> to vector<1x32xbf16>
    %401 = vector.shape_cast %398 : vector<1x32xbf16> to vector<1x1x32xbf16>
    tpu.vector_store %arg9[%c0_92, %c5, %c0_93], %401 {strides = array<i32>} : memref<1x8x32xbf16, #tpu.memory_space<vmem>>, vector<1x1x32xbf16>,
    %402 = vector.extract_strided_slice %11 {offsets = [0, 6, 0], sizes = [1, 1, 128], strides = [1, 1, 1]} : vector<1x8x128xf32> to vector<1x1x128xf32>
    %403 = vector.shape_cast %402 : vector<1x1x128xf32> to vector<1x128xf32>
    %cst_94 = arith.constant dense<0.000000e+00> : vector<1x128xf32>
    %404 = tpu.matmul %368, %13, %cst_94 {dimension_numbers = #tpu.dot_dimension_numbers<[1], [0], [0], [1], [0, 0, 1, 1], [], []>} : vector<1x32xbf16>, vector<32x128xbf16>, vector<1x128xf32> -> vector<1x128xf32>
    %405 = arith.addf %403, %404 : vector<1x128xf32>
    %406 = vector.extract_strided_slice %405 {offsets = [0, 0], sizes = [1, 32], strides = [1, 1]} : vector<1x128xf32> to vector<1x32xf32>
    %407 = arith.negf %406 : vector<1x32xf32>
    %408 = math.exp %407 : vector<1x32xf32>
    %cst_95 = arith.constant 1.000000e+00 : f32
    %409 = vector.broadcast %cst_95 : f32 to vector<1x32xf32>
    %410 = arith.addf %409, %408 : vector<1x32xf32>
    %411 = arith.divf %409, %410 : vector<1x32xf32>
    %412 = vector.extract_strided_slice %405 {offsets = [0, 32], sizes = [1, 32], strides = [1, 1]} : vector<1x128xf32> to vector<1x32xf32>
    %413 = arith.negf %412 : vector<1x32xf32>
    %414 = math.exp %413 : vector<1x32xf32>
    %cst_96 = arith.constant 1.000000e+00 : f32
    %415 = vector.broadcast %cst_96 : f32 to vector<1x32xf32>
    %416 = arith.addf %415, %414 : vector<1x32xf32>
    %417 = arith.divf %415, %416 : vector<1x32xf32>
    %418 = vector.extract_strided_slice %405 {offsets = [0, 64], sizes = [1, 32], strides = [1, 1]} : vector<1x128xf32> to vector<1x32xf32>
    %419 = math.tanh %418 : vector<1x32xf32>
    %420 = vector.extract_strided_slice %405 {offsets = [0, 96], sizes = [1, 32], strides = [1, 1]} : vector<1x128xf32> to vector<1x32xf32>
    %421 = arith.negf %420 : vector<1x32xf32>
    %422 = math.exp %421 : vector<1x32xf32>
    %cst_97 = arith.constant 1.000000e+00 : f32
    %423 = vector.broadcast %cst_97 : f32 to vector<1x32xf32>
    %424 = arith.addf %423, %422 : vector<1x32xf32>
    %425 = arith.divf %423, %424 : vector<1x32xf32>
    %426 = arith.mulf %417, %365 : vector<1x32xf32>
    %427 = arith.mulf %411, %419 : vector<1x32xf32>
    %428 = arith.addf %426, %427 : vector<1x32xf32>
    %429 = math.tanh %428 : vector<1x32xf32>
    %430 = arith.mulf %425, %429 : vector<1x32xf32>
    %431 = arith.truncf %430 : vector<1x32xf32> to vector<1x32xbf16>
    %cst_98 = arith.constant dense<0.000000e+00> : vector<1x128xf32>
    %432 = tpu.matmul %431, %14, %cst_98 {dimension_numbers = #tpu.dot_dimension_numbers<[1], [0], [0], [1], [0, 0, 1, 1], [], []>} : vector<1x32xbf16>, vector<32x128xbf16>, vector<1x128xf32> -> vector<1x128xf32>
    %cst_99 = arith.constant dense<0.000000e+00> : vector<1x128xf32>
    %433 = tpu.matmul %398, %15, %cst_99 {dimension_numbers = #tpu.dot_dimension_numbers<[1], [0], [0], [1], [0, 0, 1, 1], [], []>} : vector<1x32xbf16>, vector<32x128xbf16>, vector<1x128xf32> -> vector<1x128xf32>
    %434 = arith.addf %432, %433 : vector<1x128xf32>
    %435 = arith.addf %434, %12 : vector<1x128xf32>
    %436 = vector.extract_strided_slice %435 {offsets = [0, 0], sizes = [1, 32], strides = [1, 1]} : vector<1x128xf32> to vector<1x32xf32>
    %437 = arith.negf %436 : vector<1x32xf32>
    %438 = math.exp %437 : vector<1x32xf32>
    %cst_100 = arith.constant 1.000000e+00 : f32
    %439 = vector.broadcast %cst_100 : f32 to vector<1x32xf32>
    %440 = arith.addf %439, %438 : vector<1x32xf32>
    %441 = arith.divf %439, %440 : vector<1x32xf32>
    %442 = vector.extract_strided_slice %435 {offsets = [0, 32], sizes = [1, 32], strides = [1, 1]} : vector<1x128xf32> to vector<1x32xf32>
    %443 = arith.negf %442 : vector<1x32xf32>
    %444 = math.exp %443 : vector<1x32xf32>
    %cst_101 = arith.constant 1.000000e+00 : f32
    %445 = vector.broadcast %cst_101 : f32 to vector<1x32xf32>
    %446 = arith.addf %445, %444 : vector<1x32xf32>
    %447 = arith.divf %445, %446 : vector<1x32xf32>
    %448 = vector.extract_strided_slice %435 {offsets = [0, 64], sizes = [1, 32], strides = [1, 1]} : vector<1x128xf32> to vector<1x32xf32>
    %449 = math.tanh %448 : vector<1x32xf32>
    %450 = vector.extract_strided_slice %435 {offsets = [0, 96], sizes = [1, 32], strides = [1, 1]} : vector<1x128xf32> to vector<1x32xf32>
    %451 = arith.negf %450 : vector<1x32xf32>
    %452 = math.exp %451 : vector<1x32xf32>
    %cst_102 = arith.constant 1.000000e+00 : f32
    %453 = vector.broadcast %cst_102 : f32 to vector<1x32xf32>
    %454 = arith.addf %453, %452 : vector<1x32xf32>
    %455 = arith.divf %453, %454 : vector<1x32xf32>
    %456 = arith.mulf %447, %395 : vector<1x32xf32>
    %457 = arith.mulf %441, %449 : vector<1x32xf32>
    %458 = arith.addf %456, %457 : vector<1x32xf32>
    %459 = math.tanh %458 : vector<1x32xf32>
    %460 = arith.mulf %455, %459 : vector<1x32xf32>
    %461 = arith.truncf %460 : vector<1x32xf32> to vector<1x32xbf16>
    %c0_103 = arith.constant 0 : index
    %c6 = arith.constant 6 : index
    %c0_104 = arith.constant 0 : index
    %462 = vector.load %arg9[%c0_103, %c6, %c0_104] : memref<1x8x32xbf16, #tpu.memory_space<vmem>>, vector<1x1x32xbf16>
    %463 = vector.shape_cast %462 : vector<1x1x32xbf16> to vector<1x32xbf16>
    %464 = vector.shape_cast %461 : vector<1x32xbf16> to vector<1x1x32xbf16>
    tpu.vector_store %arg9[%c0_103, %c6, %c0_104], %464 {strides = array<i32>} : memref<1x8x32xbf16, #tpu.memory_space<vmem>>, vector<1x1x32xbf16>,
    %465 = vector.extract_strided_slice %11 {offsets = [0, 7, 0], sizes = [1, 1, 128], strides = [1, 1, 1]} : vector<1x8x128xf32> to vector<1x1x128xf32>
    %466 = vector.shape_cast %465 : vector<1x1x128xf32> to vector<1x128xf32>
    %cst_105 = arith.constant dense<0.000000e+00> : vector<1x128xf32>
    %467 = tpu.matmul %431, %13, %cst_105 {dimension_numbers = #tpu.dot_dimension_numbers<[1], [0], [0], [1], [0, 0, 1, 1], [], []>} : vector<1x32xbf16>, vector<32x128xbf16>, vector<1x128xf32> -> vector<1x128xf32>
    %468 = arith.addf %466, %467 : vector<1x128xf32>
    %469 = vector.extract_strided_slice %468 {offsets = [0, 0], sizes = [1, 32], strides = [1, 1]} : vector<1x128xf32> to vector<1x32xf32>
    %470 = arith.negf %469 : vector<1x32xf32>
    %471 = math.exp %470 : vector<1x32xf32>
    %cst_106 = arith.constant 1.000000e+00 : f32
    %472 = vector.broadcast %cst_106 : f32 to vector<1x32xf32>
    %473 = arith.addf %472, %471 : vector<1x32xf32>
    %474 = arith.divf %472, %473 : vector<1x32xf32>
    %475 = vector.extract_strided_slice %468 {offsets = [0, 32], sizes = [1, 32], strides = [1, 1]} : vector<1x128xf32> to vector<1x32xf32>
    %476 = arith.negf %475 : vector<1x32xf32>
    %477 = math.exp %476 : vector<1x32xf32>
    %cst_107 = arith.constant 1.000000e+00 : f32
    %478 = vector.broadcast %cst_107 : f32 to vector<1x32xf32>
    %479 = arith.addf %478, %477 : vector<1x32xf32>
    %480 = arith.divf %478, %479 : vector<1x32xf32>
    %481 = vector.extract_strided_slice %468 {offsets = [0, 64], sizes = [1, 32], strides = [1, 1]} : vector<1x128xf32> to vector<1x32xf32>
    %482 = math.tanh %481 : vector<1x32xf32>
    %483 = vector.extract_strided_slice %468 {offsets = [0, 96], sizes = [1, 32], strides = [1, 1]} : vector<1x128xf32> to vector<1x32xf32>
    %484 = arith.negf %483 : vector<1x32xf32>
    %485 = math.exp %484 : vector<1x32xf32>
    %cst_108 = arith.constant 1.000000e+00 : f32
    %486 = vector.broadcast %cst_108 : f32 to vector<1x32xf32>
    %487 = arith.addf %486, %485 : vector<1x32xf32>
    %488 = arith.divf %486, %487 : vector<1x32xf32>
    %489 = arith.mulf %480, %428 : vector<1x32xf32>
    %490 = arith.mulf %474, %482 : vector<1x32xf32>
    %491 = arith.addf %489, %490 : vector<1x32xf32>
    %492 = math.tanh %491 : vector<1x32xf32>
    %493 = arith.mulf %488, %492 : vector<1x32xf32>
    %494 = arith.truncf %493 : vector<1x32xf32> to vector<1x32xbf16>
    %cst_109 = arith.constant dense<0.000000e+00> : vector<1x128xf32>
    %495 = tpu.matmul %494, %14, %cst_109 {dimension_numbers = #tpu.dot_dimension_numbers<[1], [0], [0], [1], [0, 0, 1, 1], [], []>} : vector<1x32xbf16>, vector<32x128xbf16>, vector<1x128xf32> -> vector<1x128xf32>
    %cst_110 = arith.constant dense<0.000000e+00> : vector<1x128xf32>
    %496 = tpu.matmul %461, %15, %cst_110 {dimension_numbers = #tpu.dot_dimension_numbers<[1], [0], [0], [1], [0, 0, 1, 1], [], []>} : vector<1x32xbf16>, vector<32x128xbf16>, vector<1x128xf32> -> vector<1x128xf32>
    %497 = arith.addf %495, %496 : vector<1x128xf32>
    %498 = arith.addf %497, %12 : vector<1x128xf32>
    %499 = vector.extract_strided_slice %498 {offsets = [0, 0], sizes = [1, 32], strides = [1, 1]} : vector<1x128xf32> to vector<1x32xf32>
    %500 = arith.negf %499 : vector<1x32xf32>
    %501 = math.exp %500 : vector<1x32xf32>
    %cst_111 = arith.constant 1.000000e+00 : f32
    %502 = vector.broadcast %cst_111 : f32 to vector<1x32xf32>
    %503 = arith.addf %502, %501 : vector<1x32xf32>
    %504 = arith.divf %502, %503 : vector<1x32xf32>
    %505 = vector.extract_strided_slice %498 {offsets = [0, 32], sizes = [1, 32], strides = [1, 1]} : vector<1x128xf32> to vector<1x32xf32>
    %506 = arith.negf %505 : vector<1x32xf32>
    %507 = math.exp %506 : vector<1x32xf32>
    %cst_112 = arith.constant 1.000000e+00 : f32
    %508 = vector.broadcast %cst_112 : f32 to vector<1x32xf32>
    %509 = arith.addf %508, %507 : vector<1x32xf32>
    %510 = arith.divf %508, %509 : vector<1x32xf32>
    %511 = vector.extract_strided_slice %498 {offsets = [0, 64], sizes = [1, 32], strides = [1, 1]} : vector<1x128xf32> to vector<1x32xf32>
    %512 = math.tanh %511 : vector<1x32xf32>
    %513 = vector.extract_strided_slice %498 {offsets = [0, 96], sizes = [1, 32], strides = [1, 1]} : vector<1x128xf32> to vector<1x32xf32>
    %514 = arith.negf %513 : vector<1x32xf32>
    %515 = math.exp %514 : vector<1x32xf32>
    %cst_113 = arith.constant 1.000000e+00 : f32
    %516 = vector.broadcast %cst_113 : f32 to vector<1x32xf32>
    %517 = arith.addf %516, %515 : vector<1x32xf32>
    %518 = arith.divf %516, %517 : vector<1x32xf32>
    %519 = arith.mulf %510, %458 : vector<1x32xf32>
    %520 = arith.mulf %504, %512 : vector<1x32xf32>
    %521 = arith.addf %519, %520 : vector<1x32xf32>
    %522 = math.tanh %521 : vector<1x32xf32>
    %523 = arith.mulf %518, %522 : vector<1x32xf32>
    %524 = arith.truncf %523 : vector<1x32xf32> to vector<1x32xbf16>
    %c0_114 = arith.constant 0 : index
    %c7 = arith.constant 7 : index
    %c0_115 = arith.constant 0 : index
    %525 = vector.load %arg9[%c0_114, %c7, %c0_115] : memref<1x8x32xbf16, #tpu.memory_space<vmem>>, vector<1x1x32xbf16>
    %526 = vector.shape_cast %525 : vector<1x1x32xbf16> to vector<1x32xbf16>
    %527 = vector.shape_cast %524 : vector<1x32xbf16> to vector<1x1x32xbf16>
    tpu.vector_store %arg9[%c0_114, %c7, %c0_115], %527 {strides = array<i32>} : memref<1x8x32xbf16, #tpu.memory_space<vmem>>, vector<1x1x32xbf16>,
    %c0_116 = arith.constant 0 : index
    %c0_117 = arith.constant 0 : index
    %c0_118 = arith.constant 0 : index
    %528 = vector.load %arg12[%c0_116, %c0_117, %c0_118] : memref<2x1x32xbf16, #tpu.memory_space<vmem>>, vector<1x1x32xbf16>
    %529 = vector.shape_cast %528 : vector<1x1x32xbf16> to vector<1x32xbf16>
    %530 = vector.shape_cast %494 : vector<1x32xbf16> to vector<1x1x32xbf16>
    tpu.vector_store %arg12[%c0_116, %c0_117, %c0_118], %530 {strides = array<i32>} : memref<2x1x32xbf16, #tpu.memory_space<vmem>>, vector<1x1x32xbf16>,
    %c0_119 = arith.constant 0 : index
    %c0_120 = arith.constant 0 : index
    %c0_121 = arith.constant 0 : index
    %531 = vector.load %arg13[%c0_119, %c0_120, %c0_121] : memref<2x1x32xf32, #tpu.memory_space<vmem>>, vector<1x1x32xf32>
    %532 = vector.shape_cast %531 : vector<1x1x32xf32> to vector<1x32xf32>
    %533 = vector.shape_cast %491 : vector<1x32xf32> to vector<1x1x32xf32>
    tpu.vector_store %arg13[%c0_119, %c0_120, %c0_121], %533 {strides = array<i32>} : memref<2x1x32xf32, #tpu.memory_space<vmem>>, vector<1x1x32xf32>,
    %c1_122 = arith.constant 1 : index
    %c0_123 = arith.constant 0 : index
    %c0_124 = arith.constant 0 : index
    %534 = vector.load %arg12[%c1_122, %c0_123, %c0_124] : memref<2x1x32xbf16, #tpu.memory_space<vmem>>, vector<1x1x32xbf16>
    %535 = vector.shape_cast %534 : vector<1x1x32xbf16> to vector<1x32xbf16>
    %536 = vector.shape_cast %524 : vector<1x32xbf16> to vector<1x1x32xbf16>
    tpu.vector_store %arg12[%c1_122, %c0_123, %c0_124], %536 {strides = array<i32>} : memref<2x1x32xbf16, #tpu.memory_space<vmem>>, vector<1x1x32xbf16>,
    %c1_125 = arith.constant 1 : index
    %c0_126 = arith.constant 0 : index
    %c0_127 = arith.constant 0 : index
    %537 = vector.load %arg13[%c1_125, %c0_126, %c0_127] : memref<2x1x32xf32, #tpu.memory_space<vmem>>, vector<1x1x32xf32>
    %538 = vector.shape_cast %537 : vector<1x1x32xf32> to vector<1x32xf32>
    %539 = vector.shape_cast %521 : vector<1x32xf32> to vector<1x1x32xf32>
    tpu.vector_store %arg13[%c1_125, %c0_126, %c0_127], %539 {strides = array<i32>} : memref<2x1x32xf32, #tpu.memory_space<vmem>>, vector<1x1x32xf32>,
    %c1_i32 = arith.constant 1 : i32
    %540 = arith.cmpi eq, %arg1, %c1_i32 : i32
    %541 = arith.extui %540 : i1 to i32
    %c0_i32_128 = arith.constant 0 : i32
    %542 = arith.cmpi ne, %541, %c0_i32_128 : i32
    scf.if %542 {
      %543 = arith.extf %494 : vector<1x32xbf16> to vector<1x32xf32>
      %c0_129 = arith.constant 0 : index
      %c0_130 = arith.constant 0 : index
      %c0_131 = arith.constant 0 : index
      %544 = vector.load %arg10[%c0_129, %c0_130, %c0_131] : memref<1x2x32xf32, #tpu.memory_space<vmem>>, vector<1x1x32xf32>
      %545 = vector.shape_cast %544 : vector<1x1x32xf32> to vector<1x32xf32>
      %546 = vector.shape_cast %543 : vector<1x32xf32> to vector<1x1x32xf32>
      tpu.vector_store %arg10[%c0_129, %c0_130, %c0_131], %546 {strides = array<i32>} : memref<1x2x32xf32, #tpu.memory_space<vmem>>, vector<1x1x32xf32>,
      %547 = arith.extf %524 : vector<1x32xbf16> to vector<1x32xf32>
      %c0_132 = arith.constant 0 : index
      %c1_133 = arith.constant 1 : index
      %c0_134 = arith.constant 0 : index
      %548 = vector.load %arg10[%c0_132, %c1_133, %c0_134] : memref<1x2x32xf32, #tpu.memory_space<vmem>>, vector<1x1x32xf32>
      %549 = vector.shape_cast %548 : vector<1x1x32xf32> to vector<1x32xf32>
      %550 = vector.shape_cast %547 : vector<1x32xf32> to vector<1x1x32xf32>
      tpu.vector_store %arg10[%c0_132, %c1_133, %c0_134], %550 {strides = array<i32>} : memref<1x2x32xf32, #tpu.memory_space<vmem>>, vector<1x1x32xf32>,
      %c0_135 = arith.constant 0 : index
      %c0_136 = arith.constant 0 : index
      %c0_137 = arith.constant 0 : index
      %551 = vector.load %arg11[%c0_135, %c0_136, %c0_137] : memref<1x2x32xf32, #tpu.memory_space<vmem>>, vector<1x1x32xf32>
      %552 = vector.shape_cast %551 : vector<1x1x32xf32> to vector<1x32xf32>
      %553 = vector.shape_cast %491 : vector<1x32xf32> to vector<1x1x32xf32>
      tpu.vector_store %arg11[%c0_135, %c0_136, %c0_137], %553 {strides = array<i32>} : memref<1x2x32xf32, #tpu.memory_space<vmem>>, vector<1x1x32xf32>,
      %c0_138 = arith.constant 0 : index
      %c1_139 = arith.constant 1 : index
      %c0_140 = arith.constant 0 : index
      %554 = vector.load %arg11[%c0_138, %c1_139, %c0_140] : memref<1x2x32xf32, #tpu.memory_space<vmem>>, vector<1x1x32xf32>
      %555 = vector.shape_cast %554 : vector<1x1x32xf32> to vector<1x32xf32>
      %556 = vector.shape_cast %521 : vector<1x32xf32> to vector<1x1x32xf32>
      tpu.vector_store %arg11[%c0_138, %c1_139, %c0_140], %556 {strides = array<i32>} : memref<1x2x32xf32, #tpu.memory_space<vmem>>, vector<1x1x32xf32>,
    } else {
    }
    return
  }
  func.func @transform_0(%arg0: i32, %arg1: i32) -> (i32, i32, i32) {
    %c0_i32 = arith.constant 0 : i32
    %c0_i32_0 = arith.constant 0 : i32
    return %arg0, %arg1, %c0_i32 : i32, i32, i32
  }
  func.func @transform_1(%arg0: i32, %arg1: i32) -> (i32, i32) {
    %c0_i32 = arith.constant 0 : i32
    %c0_i32_0 = arith.constant 0 : i32
    %c0_i32_1 = arith.constant 0 : i32
    return %c0_i32, %c0_i32_0 : i32, i32
  }
  func.func @transform_2(%arg0: i32, %arg1: i32) -> (i32, i32) {
    %c0_i32 = arith.constant 0 : i32
    %c0_i32_0 = arith.constant 0 : i32
    %c0_i32_1 = arith.constant 0 : i32
    return %c0_i32, %c0_i32_0 : i32, i32
  }
  func.func @transform_3(%arg0: i32, %arg1: i32) -> (i32, i32) {
    %c0_i32 = arith.constant 0 : i32
    %c0_i32_0 = arith.constant 0 : i32
    %c0_i32_1 = arith.constant 0 : i32
    return %c0_i32, %c0_i32_0 : i32, i32
  }
  func.func @transform_4(%arg0: i32, %arg1: i32) -> (i32, i32) {
    %c0_i32 = arith.constant 0 : i32
    %c0_i32_0 = arith.constant 0 : i32
    %c0_i32_1 = arith.constant 0 : i32
    return %c0_i32, %c0_i32_0 : i32, i32
  }
  func.func @transform_5(%arg0: i32, %arg1: i32) -> (i32, i32) {
    %c0_i32 = arith.constant 0 : i32
    %c0_i32_0 = arith.constant 0 : i32
    %c0_i32_1 = arith.constant 0 : i32
    return %c0_i32, %c0_i32_0 : i32, i32
  }
  func.func @transform_6(%arg0: i32, %arg1: i32) -> (i32, i32) {
    %c0_i32 = arith.constant 0 : i32
    %c0_i32_0 = arith.constant 0 : i32
    %c0_i32_1 = arith.constant 0 : i32
    return %c0_i32, %c0_i32_0 : i32, i32
  }
  func.func @transform_7(%arg0: i32, %arg1: i32) -> (i32, i32, i32) {
    %c0_i32 = arith.constant 0 : i32
    %c0_i32_0 = arith.constant 0 : i32
    return %arg0, %arg1, %c0_i32 : i32, i32, i32
  }
  func.func @transform_8(%arg0: i32, %arg1: i32) -> (i32, i32, i32) {
    %c0_i32 = arith.constant 0 : i32
    %c0_i32_0 = arith.constant 0 : i32
    %c0_i32_1 = arith.constant 0 : i32
    return %arg0, %c0_i32, %c0_i32_0 : i32, i32, i32
  }
  func.func @transform_9(%arg0: i32, %arg1: i32) -> (i32, i32, i32) {
    %c0_i32 = arith.constant 0 : i32
    %c0_i32_0 = arith.constant 0 : i32
    %c0_i32_1 = arith.constant 0 : i32
    return %arg0, %c0_i32, %c0_i32_0 : i32, i32, i32
  }
}

</mosaic_0001>

<bundles_post_ra>
// kernel: rnn_forward.3
= control target key start
LH: loop header
LB: loop body
LE: loop exit
PB: predicated region body
PF: predicated region fallthrough
CT: control target
= control target key end

     0   :  { %s257_s0 = inlined_call_operand.vmem [shape: bf16[32,32], index: 0, kind: input, shape index: {}]   ;;  %s258_s1 = inlined_call_operand.vmem [shape: bf16[32,256], index: 1, kind: input, shape index: {}]   ;;  %s259_s2 = inlined_call_operand.vmem [shape: f32[1,256], index: 2, kind: input, shape index: {}]   ;;  %s260_s3 = inlined_call_operand.hbm [shape: f32[32,256], index: 3, kind: output, shape index: {}]  }
   0x1   :  { %v149_v0 = vld [vmem:[%s258_s1 + $0x10] sm:$0xf]  ;;  %v164_v1 = vld [vmem:[%s258_s1 + $0x14] sm:$0xf0]  ;;  %v163_v2 = vld [vmem:[%s258_s1 + $0x14] sm:$0xf] }
   0x2   :  { %v150_v3 = vor.u32 %v164_v1, %v149_v0  ;;  %v151_v4 = vld [vmem:[%s258_s1 + $0x18] sm:$0xf0]  ;;  %v141_v5 = vld [vmem:[%s258_s1] sm:$0xf]  ;;  %v162_v6 = vld [vmem:[%s258_s1 + $0x4] sm:$0xf0] }
   0x3   :  { %v154_v7 = vor.u32 %v163_v2, %v151_v4  ;;  %v161_v8 = vld [vmem:[%s258_s1 + $0x4] sm:$0xf]  ;;  %v143_v9 = vld [vmem:[%s258_s1 + $0x8] sm:$0xf0]  ;;  %v142_v10 = vor.u32 %v162_v6, %v141_v5 }
   0x4   :  { %73 = vmatpush.bf16.msra.mxu0 %v150_v3  ;;  %165 = vmatpush.bf16.msra.mxu2 %v150_v3 }
   0x5   :  { %8 = vsyncpa [#allocation3], 0  ;;  %92 = vmatpush.bf16.msra.mxu1 %v154_v7  ;;  %167 = vmatpush.bf16.msra.mxu3 %v154_v7  ;;  %v146_v11 = vor.u32 %v161_v8, %v143_v9  ;;  %v159_v12 = vld [vmem:[%s257_s0] sm:$0xff]  ;;  %v160_v13 = vld [vmem:[%s257_s0 + $0x8] sm:$0xff]  ;;  %vm60_vm0 = vcmask 261120   ;;  %s198_s0 = smov [#allocation2]  }
   0x6   :  { %v24_v14 = vld [vmem:[%s259_s2] sm:$0x3]  ;;  %s117_s2 = sshll.u32 %s198_s0, 4  ;;  %s119_s8 = sshll.u32 %s260_s3, 4  ;;  %s118_s2 = int_to_ptr.vmem [resolvable:$true] %s117_s2  ;;  %s120_s8 = int_to_ptr.hbm [resolvable:$true] %s119_s8 }
   0x7   :  { %v26_v15 = vperm.slane %v24_v14, 0  ;;  %v27_v16 = vperm.slane %v24_v14, 1  ;;  %s199_s9 = smov 256   ;;  %s200_s10 = smov 16  }
   0x8   :  { %74 = vmatpush.bf16.msra.mxu0 %v142_v10  ;;  %166 = vmatpush.bf16.msra.mxu2 %v142_v10 }
   0x9   :  { %93 = vmatpush.bf16.msra.mxu1 %v146_v11  ;;  %168 = vmatpush.bf16.msra.mxu3 %v146_v11 }
   0xb   :  { %155 = vmatmul.msk.bf16.vlgmr.msra.gmra.mxu0 %vm60_vm0, %v159_v12  ;;  %156 = vmatmul.msk.bf16.vlgmr.msra.gmra.mxu2 %vm60_vm0, %v160_v13 }
   0xc   :  { %157 = vmatmul.msk.bf16.vlgmr.msra.gmra.mxu1 %vm60_vm0, %v159_v12  ;;  %158 = vmatmul.msk.bf16.vlgmr.msra.gmra.mxu3 %vm60_vm0, %v160_v13 }
  0x88   :  { %v76_v17 = vpop.f32.mrf.mxu0 }
  0x89   :  { %v77_v18 = vadd.f32 %v76_v17, %v26_v15  ;;  %v95_v19 = vpop.f32.mrf.mxu1 }
  0x8a   :  { %v96_v20 = vadd.f32 %v95_v19, %v27_v16 }
  0x8b   :  { %105 = vst [vmem:[#allocation2] sm:$0xff] %v77_v18 }
  0x8c   :  { %106 = vst [vmem:[#allocation2 + $0x8] sm:$0xff] %v96_v20 }
  0x8e   :  { %v81_v21 = vpop.f32.mrf.mxu2 }
  0x8f   :  { %v82_v22 = vadd.f32 %v81_v21, %v26_v15  ;;  %v100_v23 = vpop.f32.mrf.mxu3 }
  0x90   :  { %v101_v24 = vadd.f32 %v100_v23, %v27_v16  ;;  %v78_v25 = vpop.f32.mrf.mxu0 }
  0x91   :  { %109 = vst [vmem:[#allocation2 + $0x20] sm:$0xff] %v82_v22  ;;  %v79_v26 = vadd.f32 %v78_v25, %v26_v15  ;;  %v97_v27 = vpop.f32.mrf.mxu1 }
  0x92   :  { %110 = vst [vmem:[#allocation2 + $0x28] sm:$0xff] %v101_v24  ;;  %v98_v28 = vadd.f32 %v97_v27, %v27_v16 }
  0x93   :  { %107 = vst [vmem:[#allocation2 + $0x10] sm:$0xff] %v79_v26 }
  0x94   :  { %108 = vst [vmem:[#allocation2 + $0x18] sm:$0xff] %v98_v28 }
  0x96   :  { %v83_v29 = vpop.f32.mrf.mxu2 }
  0x97   :  { %v84_v30 = vadd.f32 %v83_v29, %v26_v15  ;;  %v102_v31 = vpop.f32.mrf.mxu3 }
  0x98   :  { %v103_v32 = vadd.f32 %v102_v31, %v27_v16 }
  0x99   :  { %111 = vst [vmem:[#allocation2 + $0x30] sm:$0xff] %v84_v30 }
  0x9a   :  { %112 = vst [vmem:[#allocation2 + $0x38] sm:$0xff] %v103_v32 }
  0x9b   :  { %125 = dma.vmem_to_hbm [thread:$0]  %s118_s2, 1024, %s120_s8, [#allocation3], %s199_s9, %s199_s9, %s200_s10  }
  0x9c   :  { %196 = dma.done.wait [#allocation3], 1024  }
  0x9d   :  { %197 = vsyncadd [#allocation3], 4294966272 }
  0x9e   :  { %130 = vsyncpa [#allocation3], 1 }

// kernel: rnn_forward.2
= control target key start
LH: loop header
LB: loop body
LE: loop exit
PB: predicated region body
PF: predicated region fallthrough
CT: control target
= control target key end

     0   :  { %s2289_s30 = smov 0   ;;  %s2291_s10 = smov 0   ;;  %s2702_s0 = inlined_call_operand.vmem [shape: f32[2,16,28], index: 0, kind: input, shape index: {}]   ;;  %s2703_s1 = inlined_call_operand.vmem [shape: bf16[28,128], index: 1, kind: input, shape index: {}]   ;;  %s2704_s2 = inlined_call_operand.vmem [shape: f32[1,128], index: 2, kind: input, shape index: {}]   ;;  %s2705_s3 = inlined_call_operand.vmem [shape: bf16[32,128], index: 3, kind: input, shape index: {}]   ;;  %s2706_s4 = inlined_call_operand.vmem [shape: bf16[32,128], index: 4, kind: input, shape index: {}]   ;;  %s2707_s5 = inlined_call_operand.vmem [shape: bf16[32,128], index: 5, kind: input, shape index: {}]   ;;  %s2708_s6 = inlined_call_operand.vmem [shape: f32[1,128], index: 6, kind: input, shape index: {}]   ;;  %s2709_s7 = inlined_call_operand.vmem [shape: bf16[2,16,32], index: 7, kind: output, shape index: {0}]   ;;  %s2710_s8 = inlined_call_operand.vmem [shape: f32[2,2,32], index: 8, kind: output, shape index: {1}]   ;;  %s2711_s9 = inlined_call_operand.vmem [shape: f32[2,2,32], index: 9, kind: output, shape index: {2}]  }
   0x1   :  { %s2293_s11 = smov 0   ;;  %s2295_s12 = smov 0  }
   0x2   :  { %s2297_s13 = smov 0  }
   0x3 LB: > { %s29_s14 = sadd.s32 1, %s2224_s11  ;;  %s32_s15 = sadd.s32 1, %s2228_s12  ;;  %s2232_s13 = sphi %s2297_s13, %s20_s13   ;;  %s2228_s12 = sphi %s2295_s12, %s2721_s12   ;;  %s2224_s11 = sphi %s2293_s11, %s2720_s11   ;;  %s2220_s10 = sphi %s2291_s10, %s2719_s10   ;;  %s2216_s30 = sphi %s2289_s30, %s2718_s30  }
   0x4   : > { %p30_p0 = scmp.ge.s32.totalorder %s29_s14, 2  ;;  %p1909_p1 = scmp.ge.s32.totalorder %s2232_s13, 1 }
   0x5   : > { %p311_p2 = scmp.lt.s32.totalorder %s2232_s13, 5 }
   0x6   : > { %s2723_s14 = smov (%p30_p0, %s29_s14), 0  ;;  %s2725_s15 = smov (!%p30_p0, %s32_s15), %s2228_s12 }
   0x7   : > { %2712 = sst [smem:[#allocation4_spill]] %s2723_s14  ;;  %p312_p3 = pnand %p1909_p1, %p311_p2 }
   0x8   : > { %p34_p4 = scmp.ge.s32.totalorder %s2725_s15, 2  ;;  %p361_p5 = scmp.lt.s32.totalorder (!%p312_p3), %s2220_s10, 1 }
   0x9   : > { %315 = sbr.rel (%p312_p3) target bundleno = 5491 (0x1573), region = 48  ;;  %p363_p6 = scmp.lt.s32.totalorder (!%p312_p3), %s2216_s30, 1 }
   0xa   : > { %s2727_s15 = smov (%p34_p4, %s2725_s15), 0  ;;  %p1916_p7 = scmp.ne.s32.totalorder (!%p312_p3), %s2216_s30, 0 }
   0xb   : > { %2713 = sst [smem:[#allocation5_spill]] %s2727_s15 }
   0xe   : > { %s2729_s10 = smov (!%p361_p5, %s2220_s10), 1 }
   0xf   : > { %s364_s16 = scalar_select %p363_p6, %s2216_s30, 1 }
  0x10   : > { %s1910_s17 = sshll.u32 %s2729_s10, 1  ;;  %389 = sbr.rel (%p1916_p7) target bundleno = 26 (0x1a), region = 52 }
  0x11   : > { %s366_s18 = sadd.s32 %s1910_s17, %s364_s16  ;;  %s2326_s21 = scalar_lea.vmem %s2710_s8, %s1910_s17 }
  0x12   : > { %s1911_s22 = sshll.u32 %s366_s18, 3  ;;  %s1913_s23 = sshll.u32 %s366_s18, 2 }
  0x13   : > { %s368_s26 = scalar_lea.vmem %s2702_s0, %s1911_s22  ;;  %s2334_s29 = scalar_lea.vmem %s2709_s7, %s1913_s23 }
  0x14   : > { %s2339_s10 = scalar_lea.vmem %s2711_s9, %s1910_s17 }
  0x15   : > { %vm390_vm0 = vcmask 253952   ;;  %vm391_vm1 = vsmask.f32 256  ;;  %v393_v0 = vld [vmem:[#allocation2] sm:$0x1]  ;;  %v2234_v2 = vmov 0.0  }
  0x16   : > { %vm392_vm2 = vmand %vm390_vm0, %vm391_vm1  ;;  %v396_v1 = vld [vmem:[#allocation2 + $0x1] sm:$0x1]  ;;  %400 = vst.msk [vmem:[#allocation3] sm:$0x1] %vm390_vm0, %v2234_v2 }
  0x17   : > { %v394_v3 = vsel %vm392_vm2, 0, %v393_v0  ;;  %v397_v4 = vsel %vm392_vm2, 0, %v396_v1  ;;  %401 = vst.msk [vmem:[#allocation3 + $0x1] sm:$0x1] %vm390_vm0, %v2234_v2 }
  0x18   : > { %395 = vst [vmem:[#allocation2] sm:$0x1] %v394_v3 }
  0x19   : > { %398 = vst [vmem:[#allocation2 + $0x1] sm:$0x1] %v397_v4 }
  0x1a PF: > { %v2345_v5 = vld [vmem:[%s2705_s3 + $0x8] sm:$0xff]  ;;  %vm427_vm3 = vcmask 1045504   ;;  %v2357_v9 = vld [vmem:[%s2705_s3] sm:$0xff]  ;;  %vm475_vm4 = vcmask 261120   ;;  %vm423_vm5 = vcmask 228352   ;;  %s2236_s28 = smov 32  }
  0x1b   : > { %v1923_v6 = vld [vmem:[%s2703_s1 + $0x8] sm:$0xf]  ;;  %v1995_v7 = vld [vmem:[%s2703_s1 + $0x8] sm:$0x30]  ;;  %485 = vmatpush.bf16.msra.mxu1 %v2345_v5  ;;  %v1994_v11 = vld [vmem:[%s2703_s1] sm:$0xff]  ;;  %s2237_s16 = smov 96  }
  0x1c   : > { %v1924_v8 = vor.u32 %v1995_v7, %v1923_v6  ;;  %v402_v12 = vld [vmem:[%s368_s26] sm:$0xff]  ;;  %s2235_s26 = smov 64   ;;  %v2382_v44 = vld [vmem:[%s2707_s5 + $0x8] sm:$0xff]  ;;  %p1991_p8 = scmp.ne.s32.totalorder %s2216_s30, 1 }
  0x1d   : > { %v403_v14 = vpack.c.bf16 %v402_v12, %v402_v12  ;;  %v2057_v15 = vld [vmem:[%s2704_s2] ss:$0 sm:$0xff]  ;;  %v2058_v23 = vld [vmem:[#allocation3] ss:$0 sm:$0xff]  ;;  %557 = vmatpush.bf16.msra.mxu2 %v2382_v44 }
  0x1e   : > { %v429_v10 = vsel %vm427_vm3, %v1924_v8, 0  ;;  %v2387_v45 = vld [vmem:[%s2706_s4 + $0x8] sm:$0xff]  ;;  %v2394_v46 = vld [vmem:[%s2707_s5] sm:$0xff] }
  0x1f   : > { %437 = vmatpush.bf16.msra.mxu0 %v429_v10  ;;  %486 = vmatpush.bf16.msra.mxu1 %v2357_v9  ;;  %v457_v13 = vld [vmem:[#allocation2] sm:$0x1]  ;;  %v2399_v47 = vld [vmem:[%s2706_s4] sm:$0xff]  ;;  %v2059_v1 = vld [vmem:[#allocation3 + $0x1] ss:$0 sm:$0xff] }
  0x20   : > { %588 = vmatpush.bf16.msra.mxu3 %v2387_v45  ;;  %v460_v51 = vld [vmem:[#allocation2 + $0x1] sm:$0x1]  ;;  %v2427_v58 = vld [vmem:[%s2708_s6] sm:$0x1] }
  0x21   : > { %558 = vmatpush.bf16.msra.mxu2 %v2394_v46 }
  0x22   : > { %1934 = vmatmul.msk.bf16.vlgmr.msra.gmra.mxu1 %vm475_vm4, %v457_v13 }
  0x23   : > { %438 = vmatpush.bf16.msra.mxu0 %v1994_v11  ;;  %720 = vmatpush.bf16.msrb.mxu1 %v2382_v44 }
  0x24   : > { %589 = vmatpush.bf16.msra.mxu3 %v2399_v47  ;;  %1944 = vmatmul.msk.bf16.vlgmr.msra.gmra.mxu2 %vm475_vm4, %v460_v51 }
  0x25   : > { %741 = vmatpush.bf16.msrb.mxu2 %v2387_v45 }
  0x26   : > { %1925 = vmatmul.msk.bf16.vlgmr.msra.gmra.mxu0 %vm423_vm5, %v403_v14 }
  0x27   : > { %655 = vmatpush.bf16.msrb.mxu0 %v2345_v5  ;;  %721 = vmatpush.bf16.msrb.mxu1 %v2394_v46 }
  0x28   : > { %804 = vmatpush.bf16.msrb.mxu3 %v2345_v5 }
  0x29   : > { %742 = vmatpush.bf16.msrb.mxu2 %v2399_v47 }
  0x2b   : > { %656 = vmatpush.bf16.msrb.mxu0 %v2357_v9  ;;  %890 = vmatpush.bf16.msra.mxu1 %v2387_v45 }
  0x2c   : > { %805 = vmatpush.bf16.msrb.mxu3 %v2357_v9 }
  0x2d   : > { %953 = vmatpush.bf16.msra.mxu2 %v2345_v5 }
  0x2f   : > { %870 = vmatpush.bf16.msra.mxu0 %v2382_v44  ;;  %891 = vmatpush.bf16.msra.mxu1 %v2399_v47 }
  0x31   : > { %954 = vmatpush.bf16.msra.mxu2 %v2357_v9 }
  0x33   : > { %871 = vmatpush.bf16.msra.mxu0 %v2394_v46 }
  0x9f   : > { %v488_v16 = vpop.f32.mrf.mxu1 }
  0xa3   : > { %v440_v17 = vpop.f32.mrf.mxu0 }
  0xa4   : > { %v2369_v18 = vadd.f32 %v2057_v15, %v440_v17 }
  0xa6   : > { %v492_v19 = vadd.f32 %v488_v16, %v2369_v18 }
  0xa7   : > { %v490_v20 = vpop.f32.mrf.mxu1  ;;  %v560_v53 = vpop.f32.mrf.mxu2 }
  0xa8   : > { %2060 = vtanh.f32 %v492_v19  ;;  %v1935_v24 = vmul.f32 -1.442695, %v492_v19 }
  0xaa   : > { %2062 = vpow2.f32 %v1935_v24 }
  0xab   : > { %v442_v21 = vpop.f32.mrf.mxu0 }
  0xae   : > { %v2061_v22 = vpop.eup %2060 }
  0xaf   : > { %520 = vrot.lane.b32.xlu0 %v2061_v22, %s2235_s26  ;;  %v562_v54 = vpop.f32.mrf.mxu2 }
  0xb0   : > { %v2063_v25 = vpop.eup %2062 }
  0xb1   : > { %v496_v26 = vadd.f32 1.0, %v2063_v25 }
  0xb3   : > { %2064 = vrcp.f32 %v496_v26  ;;  %v508_v32 = vand.u32 2147483648, %v496_v26  ;;  %vm502_vm7 = vweird.f32 %v496_v26  ;;  %v506_v33 = vand.u32 2147483647, %v496_v26 }
  0xb5   : > { %v509_v35 = vor.u32 1.1754944e-38, %v508_v32  ;;  %vm507_vm9 = vcmp.eq.f32.partialorder %v506_v33, 8.507059e+37 }
  0xb7   : > { %515 = vrot.lane.b32.xlu0 %v2058_v23, %s2236_s28 }
  0xb9   : > { %v2065_v27 = vpop.eup %2064 }
  0xba   : > { %v498_v28 = vmul.f32 %v2065_v27, %v496_v26  ;;  %vm503_vm6 = vweird.f32 %v2065_v27 }
  0xbb   : > { %vm504_vm8 = vmor %vm502_vm7, %vm503_vm6 }
  0xbc   : > { %v499_v29 = vsub.f32 1.0, %v498_v28 }
  0xbe   : > { %v500_v30 = vmul.f32 %v2065_v27, %v499_v29 }
  0xc0   : > { %v501_v31 = vadd.f32 %v2065_v27, %v500_v30 }
  0xc2   : > { %v505_v34 = vsel %vm504_vm8, %v2065_v27, %v501_v31 }
  0xc3   : > { %v510_v37 = vsel %vm507_vm9, %v509_v35, %v505_v34 }
 0x121   : > { %v521_v36 = vpop.permute.xlu0 %520 }
 0x122   : > { %v523_v38 = vmul.f32 %v521_v36, %v510_v37 }
 0x124   : > { %525 = vrot.lane.b32.xlu1 %v523_v38, %s2236_s28 }
 0x129   : > { %v516_v39 = vpop.permute.xlu0 %515 }
 0x12a   : > { %v518_v40 = vmul.f32 %v516_v39, %v510_v37 }
 0x196   : > { %v526_v41 = vpop.permute.xlu1 %525 }
 0x197   : > { %v2375_v42 = vadd.f32 %v526_v41, %v518_v40 }
 0x199   : > { %2066 = vtanh.f32 %v2375_v42  ;;  %v687_v36 = vrot.slane %v2375_v42, 7 }
 0x19f   : > { %v2067_v43 = vpop.eup %2066 }
 0x1a0   : > { %531 = vrot.lane.b32.xlu1 %v2067_v43, %s2235_s26 }
 0x212   : > { %v532_v48 = vpop.permute.xlu1 %531 }
 0x213   : > { %v534_v49 = vmul.f32 %v532_v48, %v510_v37 }
 0x215   : > { %v535_v50 = vpack.c.bf16 %v534_v49, %v534_v49 }
 0x217   : > { %565 = vrot.lane.b32.xlu2 %v535_v50, %s2236_s28 }
 0x271   : > { %v566_v52 = vpop.permute.xlu2 %565 }
 0x272   : > { %1953 = vmatmul.msk.bf16.vlgmr.msra.gmra.mxu3 %vm475_vm4, %v566_v52  ;;  %1955 = vmatmul.msk.bf16.vlgmr.msrb.gmra.mxu0 %vm475_vm4, %v566_v52 }
 0x273   : > { %1040 = vmatpush.bf16.msrb.mxu0 %v2387_v45  ;;  %1018 = vmatpush.bf16.msra.mxu3 %v2382_v44 }
 0x277   : > { %1041 = vmatpush.bf16.msrb.mxu0 %v2399_v47  ;;  %1019 = vmatpush.bf16.msra.mxu3 %v2394_v46 }
 0x2ef   : > { %v658_v55 = vpop.f32.mrf.mxu0 }
 0x2f0   : > { %v663_v56 = vrot.slane %v658_v55, 7 }
 0x2f2   : > { %v665_v57 = vadd.f32 %v663_v56, %v2369_v18 }
 0x2f4   : > { %2068 = vtanh.f32 %v665_v57  ;;  %v1956_v3 = vmul.f32 -1.442695, %v665_v57 }
 0x2f5   : > { %v591_v59 = vpop.f32.mrf.mxu3 }
 0x2f6   : > { %v592_v60 = vadd.f32 %v591_v59, %v560_v53 }
 0x2f7   : > { %v660_v61 = vpop.f32.mrf.mxu0 }
 0x2f8   : > { %v595_v62 = vadd.f32 %v592_v60, %v2427_v58 }
 0x2fa   : > { %v2069_v63 = vpop.eup %2068  ;;  %2070 = vtanh.f32 %v595_v62  ;;  %v1954_v10 = vmul.f32 -1.442695, %v595_v62 }
 0x2fb   : > { %691 = vrot.lane.b32.xlu2 %v2069_v63, %s2235_s26  ;;  %2072 = vpow2.f32 %v1956_v3 }
 0x2fd   : > { %v593_v0 = vpop.f32.mrf.mxu3 }
 0x300   : > { %v2071_v2 = vpop.eup %2070 }
 0x301   : > { %623 = vrot.lane.b32.xlu0 %v2071_v2, %s2235_s26  ;;  %v2073_v4 = vpop.eup %2072 }
 0x302   : > { %v669_v6 = vadd.f32 1.0, %v2073_v4 }
 0x303   : > { %618 = vrot.lane.b32.xlu2 %v2059_v1, %s2236_s28 }
 0x304   : > { %2074 = vrcp.f32 %v669_v6  ;;  %v681_v14 = vand.u32 2147483648, %v669_v6  ;;  %vm675_vm11 = vweird.f32 %v669_v6  ;;  %v679_v16 = vand.u32 2147483647, %v669_v6 }
 0x305   : > { %2076 = vpow2.f32 %v1954_v10 }
 0x306   : > { %v682_v20 = vor.u32 1.1754944e-38, %v681_v14  ;;  %vm680_vm13 = vcmp.eq.f32.partialorder %v679_v16, 8.507059e+37 }
 0x30a   : > { %v2075_v7 = vpop.eup %2074 }
 0x30b   : > { %v671_v8 = vmul.f32 %v2075_v7, %v669_v6  ;;  %vm676_vm10 = vweird.f32 %v2075_v7  ;;  %v2077_v15 = vpop.eup %2076 }
 0x30c   : > { %vm677_vm12 = vmor %vm675_vm11, %vm676_vm10  ;;  %v599_v19 = vadd.f32 1.0, %v2077_v15 }
 0x30d   : > { %v672_v11 = vsub.f32 1.0, %v671_v8 }
 0x30e   : > { %2078 = vrcp.f32 %v599_v19  ;;  %v611_v29 = vand.u32 2147483648, %v599_v19  ;;  %vm605_vm15 = vweird.f32 %v599_v19  ;;  %v609_v30 = vand.u32 2147483647, %v599_v19 }
 0x30f   : > { %v673_v12 = vmul.f32 %v2075_v7, %v672_v11 }
 0x310   : > { %v612_v32 = vor.u32 1.1754944e-38, %v611_v29  ;;  %vm610_vm1 = vcmp.eq.f32.partialorder %v609_v30, 8.507059e+37 }
 0x311   : > { %v674_v13 = vadd.f32 %v2075_v7, %v673_v12 }
 0x313   : > { %v678_v17 = vsel %vm677_vm12, %v2075_v7, %v674_v13 }
 0x314   : > { %v683_v22 = vsel %vm680_vm13, %v682_v20, %v678_v17  ;;  %v2079_v24 = vpop.eup %2078 }
 0x315   : > { %v601_v25 = vmul.f32 %v2079_v24, %v599_v19  ;;  %vm606_vm14 = vweird.f32 %v2079_v24  ;;  %v689_v37 = vmul.f32 %v687_v36, %v683_v22 }
 0x316   : > { %vm607_vm0 = vmor %vm605_vm15, %vm606_vm14 }
 0x317   : > { %v602_v26 = vsub.f32 1.0, %v601_v25 }
 0x319   : > { %v603_v27 = vmul.f32 %v2079_v24, %v602_v26 }
 0x31b   : > { %v604_v28 = vadd.f32 %v2079_v24, %v603_v27 }
 0x31d   : > { %v608_v31 = vsel %vm607_vm0, %v2079_v24, %v604_v28 }
 0x31e   : > { %v613_v33 = vsel %vm610_vm1, %v612_v32, %v608_v31 }
 0x355   : > { %v692_v21 = vpop.permute.xlu2 %691 }
 0x356   : > { %v694_v23 = vmul.f32 %v692_v21, %v683_v22 }
 0x358   : > { %696 = vrot.lane.b32.xlu1 %v694_v23, %s2236_s28 }
 0x35d   : > { %v619_v41 = vpop.permute.xlu2 %618 }
 0x35e   : > { %v621_v43 = vmul.f32 %v619_v41, %v613_v33 }
 0x373   : > { %v624_v34 = vpop.permute.xlu0 %623 }
 0x374   : > { %v626_v35 = vmul.f32 %v624_v34, %v613_v33 }
 0x376   : > { %628 = vrot.lane.b32.xlu0 %v626_v35, %s2236_s28 }
 0x3ca   : > { %v697_v38 = vpop.permute.xlu1 %696 }
 0x3cb   : > { %v2436_v39 = vadd.f32 %v697_v38, %v689_v37 }
 0x3cd   : > { %2080 = vtanh.f32 %v2436_v39 }
 0x3d3   : > { %v2081_v40 = vpop.eup %2080 }
 0x3d4   : > { %702 = vrot.lane.b32.xlu1 %v2081_v40, %s2235_s26 }
 0x3e8   : > { %v629_v48 = vpop.permute.xlu0 %628 }
 0x3e9   : > { %v2440_v49 = vadd.f32 %v629_v48, %v621_v43 }
 0x3eb   : > { %2082 = vtanh.f32 %v2440_v49 }
 0x3f1   : > { %v2083_v50 = vpop.eup %2082 }
 0x3f2   : > { %634 = vrot.lane.b32.xlu2 %v2083_v50, %s2235_s26  ;;  %v836_v50 = vrot.slane %v2436_v39, 7 }
 0x446   : > { %v703_v42 = vpop.permute.xlu1 %702 }
 0x447   : > { %v705_v51 = vmul.f32 %v703_v42, %v683_v22 }
 0x449   : > { %v706_v52 = vpack.c.bf16 %v705_v51, %v705_v51 }
 0x44b   : > { %v728_v53 = vshrl.u32 %v706_v52, 16 }
 0x44c   : > { %v635_v54 = vpop.permute.xlu2 %634 }
 0x44d   : > { %v637_v55 = vmul.f32 %v635_v54, %v613_v33  ;;  %730 = vrot.lane.b32.xlu0 %v728_v53, %s2236_s28 }
 0x44f   : > { %v2445_v56 = vpack.c.bf16 %v637_v55, %v637_v55 }
 0x451   : > { %v707_v57 = vunpack.c.l.b16 %v2445_v56 }
 0x453   : > { %v708_v59 = vpack.c.b16 %v707_v57, %v707_v57 }
 0x455   : > { %709 = vrot.lane.b32.xlu1 %v708_v59, %s2236_s28 }
 0x4bf   : > { %v731_v60 = vpop.permute.xlu0 %730 }
 0x4c0   : > { %1958 = vmatmul.msk.bf16.vlgmr.msrb.gmra.mxu2 %vm475_vm4, %v731_v60  ;;  %1960 = vmatmul.msk.bf16.vlgmr.msrb.gmra.mxu3 %vm475_vm4, %v731_v60 }
 0x4c1   : > { %1190 = vmatpush.bf16.msrb.mxu3 %v2387_v45  ;;  %1170 = vmatpush.bf16.msrb.mxu2 %v2382_v44 }
 0x4c5   : > { %1191 = vmatpush.bf16.msrb.mxu3 %v2399_v47  ;;  %1171 = vmatpush.bf16.msrb.mxu2 %v2394_v46 }
 0x4c7   : > { %v710_v61 = vpop.permute.xlu1 %709 }
 0x4c8   : > { %1957 = vmatmul.msk.bf16.vlgmr.msrb.gmra.mxu1 %vm475_vm4, %v710_v61 }
 0x4c9   : > { %1104 = vmatpush.bf16.msrb.mxu1 %v2345_v5 }
 0x4cd   : > { %1105 = vmatpush.bf16.msrb.mxu1 %v2357_v9 }
 0x543   : > { %v744_v62 = vpop.f32.mrf.mxu2  ;;  %v807_v63 = vpop.f32.mrf.mxu3 }
 0x544   : > { %v812_v0 = vrot.slane %v807_v63, 6 }
 0x545   : > { %v723_v1 = vpop.f32.mrf.mxu1 }
 0x546   : > { %v814_v2 = vadd.f32 %v812_v0, %v2369_v18  ;;  %v745_v3 = vadd.f32 %v744_v62, %v723_v1 }
 0x548   : > { %2084 = vtanh.f32 %v814_v2  ;;  %v748_v4 = vadd.f32 %v745_v3, %v2427_v58  ;;  %v1961_v15 = vmul.f32 -1.442695, %v814_v2 }
 0x54a   : > { %2086 = vtanh.f32 %v748_v4  ;;  %v1959_v12 = vmul.f32 -1.442695, %v748_v4 }
 0x54b   : > { %v746_v6 = vpop.f32.mrf.mxu2  ;;  %v809_v7 = vpop.f32.mrf.mxu3 }
 0x54c   : > { %2088 = vpow2.f32 %v1959_v12 }
 0x54d   : > { %v725_v8 = vpop.f32.mrf.mxu1 }
 0x54e   : > { %v2085_v10 = vpop.eup %2084 }
 0x54f   : > { %840 = vrot.lane.b32.xlu0 %v2085_v10, %s2235_s26 }
 0x550   : > { %v2087_v11 = vpop.eup %2086 }
 0x551   : > { %771 = vrot.lane.b32.xlu2 %v2087_v11, %s2235_s26 }
 0x552   : > { %v2089_v13 = vpop.eup %2088 }
 0x553   : > { %v752_v14 = vadd.f32 1.0, %v2089_v13 }
 0x555   : > { %2090 = vrcp.f32 %v752_v14  ;;  %v764_v24 = vand.u32 2147483648, %v752_v14  ;;  %vm758_vm3 = vweird.f32 %v752_v14  ;;  %v762_v25 = vand.u32 2147483647, %v752_v14 }
 0x556   : > { %2092 = vpow2.f32 %v1961_v15 }
 0x557   : > { %v765_v27 = vor.u32 1.1754944e-38, %v764_v24  ;;  %vm763_vm6 = vcmp.eq.f32.partialorder %v762_v25, 8.507059e+37 }
 0x55b   : > { %v2091_v16 = vpop.eup %2090 }
 0x55c   : > { %v754_v17 = vmul.f32 %v2091_v16, %v752_v14  ;;  %v2093_v20 = vpop.eup %2092  ;;  %vm759_vm2 = vweird.f32 %v2091_v16 }
 0x55d   : > { %v818_v21 = vadd.f32 1.0, %v2093_v20  ;;  %vm760_vm5 = vmor %vm758_vm3, %vm759_vm2 }
 0x55e   : > { %v755_v19 = vsub.f32 1.0, %v754_v17 }
 0x55f   : > { %2094 = vrcp.f32 %v818_v21  ;;  %v830_v36 = vand.u32 2147483648, %v818_v21  ;;  %vm824_vm8 = vweird.f32 %v818_v21  ;;  %v828_v37 = vand.u32 2147483647, %v818_v21 }
 0x560   : > { %v756_v22 = vmul.f32 %v2091_v16, %v755_v19 }
 0x561   : > { %v831_v40 = vor.u32 1.1754944e-38, %v830_v36  ;;  %vm829_vm10 = vcmp.eq.f32.partialorder %v828_v37, 8.507059e+37 }
 0x562   : > { %v757_v23 = vadd.f32 %v2091_v16, %v756_v22 }
 0x564   : > { %v761_v26 = vsel %vm760_vm5, %v2091_v16, %v757_v23 }
 0x565   : > { %v2095_v28 = vpop.eup %2094  ;;  %v766_v30 = vsel %vm763_vm6, %v765_v27, %v761_v26 }
 0x566   : > { %v820_v32 = vmul.f32 %v2095_v28, %v818_v21  ;;  %vm825_vm7 = vweird.f32 %v2095_v28  ;;  %v769_v53 = vmul.f32 %v766_v30, %v2440_v49 }
 0x567   : > { %vm826_vm9 = vmor %vm824_vm8, %vm825_vm7 }
 0x568   : > { %v821_v33 = vsub.f32 1.0, %v820_v32 }
 0x56a   : > { %v822_v34 = vmul.f32 %v2095_v28, %v821_v33 }
 0x56c   : > { %v823_v35 = vadd.f32 %v2095_v28, %v822_v34 }
 0x56e   : > { %v827_v38 = vsel %vm826_vm9, %v2095_v28, %v823_v35 }
 0x56f   : > { %v832_v43 = vsel %vm829_vm10, %v831_v40, %v827_v38 }
 0x570   : > { %v838_v42 = vmul.f32 %v836_v50, %v832_v43 }
 0x5ab   : > { %v772_v29 = vpop.permute.xlu2 %771 }
 0x5ac   : > { %v774_v31 = vmul.f32 %v772_v29, %v766_v30 }
 0x5ae   : > { %776 = vrot.lane.b32.xlu1 %v774_v31, %s2236_s28 }
 0x5c1   : > { %v841_v41 = vpop.permute.xlu0 %840 }
 0x5c2   : > { %v843_v48 = vmul.f32 %v841_v41, %v832_v43 }
 0x5c4   : > { %845 = vrot.lane.b32.xlu2 %v843_v48, %s2236_s28 }
 0x61e   : > { %v846_v51 = vpop.permute.xlu2 %845 }
 0x61f   : > { %v2465_v52 = vadd.f32 %v846_v51, %v838_v42 }
 0x620   : > { %v777_v54 = vpop.permute.xlu1 %776 }
 0x621   : > { %2096 = vtanh.f32 %v2465_v52  ;;  %v2469_v55 = vadd.f32 %v777_v54, %v769_v53 }
 0x623   : > { %2098 = vtanh.f32 %v2469_v55 }
 0x627   : > { %v2097_v57 = vpop.eup %2096 }
 0x628   : > { %851 = vrot.lane.b32.xlu1 %v2097_v57, %s2235_s26 }
 0x629   : > { %v2099_v59 = vpop.eup %2098 }
 0x62a   : > { %782 = vrot.lane.b32.xlu0 %v2099_v59, %s2235_s26 }
 0x69a   : > { %v852_v39 = vpop.permute.xlu1 %851 }
 0x69b   : > { %v854_v60 = vmul.f32 %v852_v39, %v832_v43  ;;  %v985_v39 = vrot.slane %v2465_v52, 7 }
 0x69c   : > { %v783_v62 = vpop.permute.xlu0 %782 }
 0x69d   : > { %v855_v61 = vpack.c.bf16 %v854_v60, %v854_v60  ;;  %v785_v63 = vmul.f32 %v783_v62, %v766_v30 }
 0x69f   : > { %v878_v0 = vrot.slane %v855_v61, 1  ;;  %v2474_v49 = vpack.c.bf16 %v785_v63, %v785_v63 }
 0x6a1   : > { %879 = vrot.lane.b32.xlu0 %v878_v0, %s2236_s28  ;;  %v857_v1 = vunpack.c.l.b16 %v2474_v49 }
 0x6a3   : > { %v858_v2 = vpack.c.b16 %v857_v1, %v857_v1 }
 0x6a5   : > { %859 = vrot.lane.b32.xlu2 %v858_v2, %s2236_s28 }
 0x6ff   : > { %v860_v3 = vpop.permute.xlu2 %859 }
 0x700   : > { %1962 = vmatmul.msk.bf16.vlgmr.msra.gmra.mxu0 %vm475_vm4, %v860_v3 }
 0x701   : > { %1253 = vmatpush.bf16.msra.mxu0 %v2345_v5 }
 0x705   : > { %1254 = vmatpush.bf16.msra.mxu0 %v2357_v9 }
 0x713   : > { %v880_v4 = vpop.permute.xlu0 %879 }
 0x714   : > { %1963 = vmatmul.msk.bf16.vlgmr.msra.gmra.mxu1 %vm475_vm4, %v880_v4  ;;  %1965 = vmatmul.msk.bf16.vlgmr.msra.gmra.mxu2 %vm475_vm4, %v880_v4 }
 0x715   : > { %1340 = vmatpush.bf16.msra.mxu2 %v2387_v45  ;;  %1318 = vmatpush.bf16.msra.mxu1 %v2382_v44 }
 0x719   : > { %1341 = vmatpush.bf16.msra.mxu2 %v2399_v47  ;;  %1319 = vmatpush.bf16.msra.mxu1 %v2394_v46 }
 0x77d   : > { %v873_v6 = vpop.f32.mrf.mxu0 }
 0x785   : > { %v875_v7 = vpop.f32.mrf.mxu0 }
 0x791   : > { %v893_v8 = vpop.f32.mrf.mxu1 }
 0x792   : > { %v894_v10 = vadd.f32 %v893_v8, %v873_v6 }
 0x794   : > { %v897_v11 = vadd.f32 %v894_v10, %v2427_v58 }
 0x796   : > { %2100 = vtanh.f32 %v897_v11  ;;  %v1964_v23 = vmul.f32 -1.442695, %v897_v11 }
 0x797   : > { %v956_v12 = vpop.f32.mrf.mxu2 }
 0x798   : > { %v961_v13 = vrot.slane %v956_v12, 5 }
 0x799   : > { %v895_v14 = vpop.f32.mrf.mxu1 }
 0x79a   : > { %v963_v15 = vadd.f32 %v961_v13, %v2369_v18 }
 0x79c   : > { %v2101_v16 = vpop.eup %2100  ;;  %2102 = vtanh.f32 %v963_v15  ;;  %v1966_v20 = vmul.f32 -1.442695, %v963_v15 }
 0x79d   : > { %920 = vrot.lane.b32.xlu1 %v2101_v16, %s2235_s26 }
 0x79e   : > { %2104 = vpow2.f32 %v1966_v20 }
 0x79f   : > { %v958_v17 = vpop.f32.mrf.mxu2 }
 0x7a2   : > { %v2103_v19 = vpop.eup %2102 }
 0x7a3   : > { %989 = vrot.lane.b32.xlu2 %v2103_v19, %s2235_s26 }
 0x7a4   : > { %v2105_v21 = vpop.eup %2104 }
 0x7a5   : > { %v967_v22 = vadd.f32 1.0, %v2105_v21 }
 0x7a7   : > { %2106 = vrcp.f32 %v967_v22  ;;  %v979_v31 = vand.u32 2147483648, %v967_v22  ;;  %vm973_vm12 = vweird.f32 %v967_v22  ;;  %v977_v32 = vand.u32 2147483647, %v967_v22 }
 0x7a8   : > { %2108 = vpow2.f32 %v1964_v23 }
 0x7a9   : > { %v980_v35 = vor.u32 1.1754944e-38, %v979_v31  ;;  %vm978_vm14 = vcmp.eq.f32.partialorder %v977_v32, 8.507059e+37 }
 0x7ad   : > { %v2107_v24 = vpop.eup %2106 }
 0x7ae   : > { %v969_v25 = vmul.f32 %v2107_v24, %v967_v22  ;;  %v2109_v26 = vpop.eup %2108  ;;  %vm974_vm11 = vweird.f32 %v2107_v24 }
 0x7af   : > { %v901_v28 = vadd.f32 1.0, %v2109_v26  ;;  %vm975_vm13 = vmor %vm973_vm12, %vm974_vm11 }
 0x7b0   : > { %v970_v27 = vsub.f32 1.0, %v969_v25 }
 0x7b1   : > { %2110 = vrcp.f32 %v901_v28  ;;  %v913_v50 = vand.u32 2147483648, %v901_v28  ;;  %vm907_vm0 = vweird.f32 %v901_v28  ;;  %v911_v42 = vand.u32 2147483647, %v901_v28 }
 0x7b2   : > { %v971_v29 = vmul.f32 %v2107_v24, %v970_v27 }
 0x7b3   : > { %v914_v53 = vor.u32 1.1754944e-38, %v913_v50  ;;  %vm912_vm2 = vcmp.eq.f32.partialorder %v911_v42, 8.507059e+37 }
 0x7b4   : > { %v972_v30 = vadd.f32 %v2107_v24, %v971_v29 }
 0x7b6   : > { %v976_v34 = vsel %vm975_vm13, %v2107_v24, %v972_v30 }
 0x7b7   : > { %v2111_v33 = vpop.eup %2110  ;;  %v981_v38 = vsel %vm978_vm14, %v980_v35, %v976_v34 }
 0x7b8   : > { %v903_v36 = vmul.f32 %v2111_v33, %v901_v28  ;;  %vm908_vm15 = vweird.f32 %v2111_v33  ;;  %v987_v60 = vmul.f32 %v985_v39, %v981_v38 }
 0x7b9   : > { %vm909_vm1 = vmor %vm907_vm0, %vm908_vm15 }
 0x7ba   : > { %v904_v41 = vsub.f32 1.0, %v903_v36 }
 0x7bc   : > { %v905_v43 = vmul.f32 %v2111_v33, %v904_v41 }
 0x7be   : > { %v906_v48 = vadd.f32 %v2111_v33, %v905_v43 }
 0x7c0   : > { %v910_v51 = vsel %vm909_vm1, %v2111_v33, %v906_v48 }
 0x7c1   : > { %v915_v57 = vsel %vm912_vm2, %v914_v53, %v910_v51 }
 0x7c2   : > { %v918_v0 = vmul.f32 %v915_v57, %v2469_v55 }
 0x7fd   : > { %v990_v37 = vpop.permute.xlu2 %989 }
 0x7fe   : > { %v992_v40 = vmul.f32 %v990_v37, %v981_v38 }
 0x800   : > { %994 = vrot.lane.b32.xlu1 %v992_v40, %s2236_s28 }
 0x80f   : > { %v921_v54 = vpop.permute.xlu1 %920 }
 0x810   : > { %v923_v59 = vmul.f32 %v921_v54, %v915_v57 }
 0x812   : > { %925 = vrot.lane.b32.xlu0 %v923_v59, %s2236_s28 }
 0x872   : > { %v995_v61 = vpop.permute.xlu1 %994 }
 0x873   : > { %v2495_v62 = vadd.f32 %v995_v61, %v987_v60 }
 0x875   : > { %2112 = vtanh.f32 %v2495_v62 }
 0x87b   : > { %v2113_v63 = vpop.eup %2112 }
 0x87c   : > { %1000 = vrot.lane.b32.xlu0 %v2113_v63, %s2235_s26 }
 0x884   : > { %v926_v1 = vpop.permute.xlu0 %925 }
 0x885   : > { %v2500_v2 = vadd.f32 %v926_v1, %v918_v0 }
 0x887   : > { %2114 = vtanh.f32 %v2500_v2 }
 0x88d   : > { %v2115_v3 = vpop.eup %2114 }
 0x88e   : > { %931 = vrot.lane.b32.xlu2 %v2115_v3, %s2235_s26 }
 0x8e8   : > { %v932_v52 = vpop.permute.xlu2 %931 }
 0x8e9   : > { %v934_v4 = vmul.f32 %v932_v52, %v915_v57 }
 0x8eb   : > { %v2504_v6 = vpack.c.bf16 %v934_v4, %v934_v4 }
 0x8ed   : > { %v1005_v7 = vunpack.c.l.b16 %v2504_v6 }
 0x8ee   : > { %v1001_v8 = vpop.permute.xlu0 %1000 }
 0x8ef   : > { %v1006_v10 = vpack.c.b16 %v1005_v7, %v1005_v7  ;;  %v1003_v11 = vmul.f32 %v1001_v8, %v981_v38  ;;  %v1136_v7 = vrot.slane %v2495_v62, 7 }
 0x8f1   : > { %v1004_v12 = vpack.c.bf16 %v1003_v11, %v1003_v11  ;;  %1007 = vrot.lane.b32.xlu1 %v1006_v10, %s2236_s28 }
 0x8f3   : > { %v1026_v55 = vshrl.u32 %v1004_v12, 16 }
 0x8f5   : > { %v1028_v13 = vrot.slane %v1026_v55, 1 }
 0x8f7   : > { %1029 = vrot.lane.b32.xlu2 %v1028_v13, %s2236_s28 }
 0x951   : > { %v1030_v14 = vpop.permute.xlu2 %1029 }
 0x952   : > { %1968 = vmatmul.msk.bf16.vlgmr.msrb.gmra.mxu0 %vm475_vm4, %v1030_v14  ;;  %1970 = vmatmul.msk.bf16.vlgmr.msrb.gmra.mxu1 %vm475_vm4, %v1030_v14 }
 0x953   : > { %1490 = vmatpush.bf16.msrb.mxu1 %v2387_v45  ;;  %1470 = vmatpush.bf16.msrb.mxu0 %v2382_v44 }
 0x957   : > { %1491 = vmatpush.bf16.msrb.mxu1 %v2399_v47  ;;  %1471 = vmatpush.bf16.msrb.mxu0 %v2394_v46 }
 0x963   : > { %v1008_v15 = vpop.permute.xlu1 %1007 }
 0x964   : > { %1967 = vmatmul.msk.bf16.vlgmr.msra.gmra.mxu3 %vm475_vm4, %v1008_v15 }
 0x965   : > { %1404 = vmatpush.bf16.msra.mxu3 %v2345_v5 }
 0x969   : > { %1405 = vmatpush.bf16.msra.mxu3 %v2357_v9 }
 0x9cf   : > { %v1043_v16 = vpop.f32.mrf.mxu0  ;;  %v1107_v17 = vpop.f32.mrf.mxu1 }
 0x9d0   : > { %v1112_v19 = vrot.slane %v1107_v17, 4 }
 0x9d2   : > { %v1114_v20 = vadd.f32 %v1112_v19, %v2369_v18 }
 0x9d4   : > { %2116 = vtanh.f32 %v1114_v20  ;;  %v1971_v29 = vmul.f32 -1.442695, %v1114_v20 }
 0x9d7   : > { %v1045_v21 = vpop.f32.mrf.mxu0  ;;  %v1109_v22 = vpop.f32.mrf.mxu1 }
 0x9da   : > { %v2117_v23 = vpop.eup %2116 }
 0x9db   : > { %1140 = vrot.lane.b32.xlu1 %v2117_v23, %s2235_s26 }
 0x9e7   : > { %v1021_v24 = vpop.f32.mrf.mxu3 }
 0x9e8   : > { %v1044_v25 = vadd.f32 %v1043_v16, %v1021_v24  ;;  %v788_v24 = vshll.u32 %v2474_v49, 16 }
 0x9ea   : > { %v1047_v26 = vadd.f32 %v1044_v25, %v2427_v58 }
 0x9ec   : > { %2118 = vtanh.f32 %v1047_v26  ;;  %v1969_v33 = vmul.f32 -1.442695, %v1047_v26 }
 0x9ed   : > { %2120 = vpow2.f32 %v1971_v29 }
 0x9ef   : > { %v1023_v27 = vpop.f32.mrf.mxu3 }
 0x9f2   : > { %v2119_v28 = vpop.eup %2118 }
 0x9f3   : > { %1070 = vrot.lane.b32.xlu0 %v2119_v28, %s2235_s26  ;;  %v2121_v30 = vpop.eup %2120 }
 0x9f4   : > { %v1118_v31 = vadd.f32 1.0, %v2121_v30 }
 0x9f6   : > { %2122 = vrcp.f32 %v1118_v31  ;;  %v1130_v41 = vand.u32 2147483648, %v1118_v31  ;;  %vm1124_vm5 = vweird.f32 %v1118_v31  ;;  %v1128_v43 = vand.u32 2147483647, %v1118_v31 }
 0x9f7   : > { %2124 = vpow2.f32 %v1969_v33 }
 0x9f8   : > { %v1131_v50 = vor.u32 1.1754944e-38, %v1130_v41  ;;  %vm1129_vm7 = vcmp.eq.f32.partialorder %v1128_v43, 8.507059e+37 }
 0x9fc   : > { %v2123_v32 = vpop.eup %2122 }
 0x9fd   : > { %v1120_v34 = vmul.f32 %v2123_v32, %v1118_v31  ;;  %v2125_v36 = vpop.eup %2124  ;;  %vm1125_vm3 = vweird.f32 %v2123_v32 }
 0x9fe   : > { %v1051_v38 = vadd.f32 1.0, %v2125_v36  ;;  %vm1126_vm6 = vmor %vm1124_vm5, %vm1125_vm3 }
 0x9ff   : > { %v1121_v35 = vsub.f32 1.0, %v1120_v34 }
 0xa00   : > { %2126 = vrcp.f32 %v1051_v38  ;;  %v1063_v61 = vand.u32 2147483648, %v1051_v38  ;;  %vm1057_vm9 = vweird.f32 %v1051_v38  ;;  %v1061_v63 = vand.u32 2147483647, %v1051_v38 }
 0xa01   : > { %v1122_v37 = vmul.f32 %v2123_v32, %v1121_v35 }
 0xa02   : > { %v1064_v1 = vor.u32 1.1754944e-38, %v1063_v61  ;;  %vm1062_vm11 = vcmp.eq.f32.partialorder %v1061_v63, 8.507059e+37 }
 0xa03   : > { %v1123_v40 = vadd.f32 %v2123_v32, %v1122_v37 }
 0xa05   : > { %v1127_v48 = vsel %vm1126_vm6, %v2123_v32, %v1123_v40 }
 0xa06   : > { %v1132_v51 = vsel %vm1129_vm7, %v1131_v50, %v1127_v48  ;;  %v2127_v54 = vpop.eup %2126 }
 0xa07   : > { %v1053_v57 = vmul.f32 %v2127_v54, %v1051_v38  ;;  %vm1058_vm8 = vweird.f32 %v2127_v54  ;;  %v1138_v8 = vmul.f32 %v1136_v7, %v1132_v51 }
 0xa08   : > { %vm1059_vm10 = vmor %vm1057_vm9, %vm1058_vm8 }
 0xa09   : > { %v1054_v59 = vsub.f32 1.0, %v1053_v57 }
 0xa0b   : > { %v1055_v39 = vmul.f32 %v2127_v54, %v1054_v59 }
 0xa0d   : > { %v1056_v60 = vadd.f32 %v2127_v54, %v1055_v39 }
 0xa0f   : > { %v1060_v0 = vsel %vm1059_vm10, %v2127_v54, %v1056_v60 }
 0xa10   : > { %v1065_v52 = vsel %vm1062_vm11, %v1064_v1, %v1060_v0 }
 0xa11   : > { %v1068_v10 = vmul.f32 %v1065_v52, %v2500_v2 }
 0xa4d   : > { %v1141_v42 = vpop.permute.xlu1 %1140 }
 0xa4e   : > { %v1143_v53 = vmul.f32 %v1141_v42, %v1132_v51 }
 0xa50   : > { %1145 = vrot.lane.b32.xlu0 %v1143_v53, %s2236_s28 }
 0xa65   : > { %v1071_v3 = vpop.permute.xlu0 %1070 }
 0xa66   : > { %v1073_v4 = vmul.f32 %v1071_v3, %v1065_v52 }
 0xa68   : > { %1075 = vrot.lane.b32.xlu2 %v1073_v4, %s2236_s28 }
 0xac2   : > { %v1146_v11 = vpop.permute.xlu0 %1145  ;;  %v1076_v12 = vpop.permute.xlu2 %1075 }
 0xac3   : > { %v2526_v55 = vadd.f32 %v1146_v11, %v1138_v8  ;;  %v2528_v13 = vadd.f32 %v1076_v12, %v1068_v10 }
 0xac5   : > { %2128 = vtanh.f32 %v2526_v55 }
 0xac6   : > { %2130 = vtanh.f32 %v2528_v13 }
 0xacb   : > { %v2129_v14 = vpop.eup %2128 }
 0xacc   : > { %v2131_v15 = vpop.eup %2130  ;;  %1151 = vrot.lane.b32.xlu2 %v2129_v14, %s2235_s26 }
 0xacd   : > { %1081 = vrot.lane.b32.xlu1 %v2131_v15, %s2235_s26  ;;  %v1285_v15 = vrot.slane %v2526_v55, 7 }
 0xb26   : > { %v1152_v62 = vpop.permute.xlu2 %1151 }
 0xb27   : > { %v1154_v16 = vmul.f32 %v1152_v62, %v1132_v51 }
 0xb29   : > { %v1155_v17 = vpack.c.bf16 %v1154_v16, %v1154_v16 }
 0xb2b   : > { %v1178_v2 = vrot.slane %v1155_v17, 2 }
 0xb2d   : > { %1179 = vrot.lane.b32.xlu0 %v1178_v2, %s2236_s28 }
 0xb3f   : > { %v1082_v19 = vpop.permute.xlu1 %1081 }
 0xb40   : > { %v1084_v20 = vmul.f32 %v1082_v19, %v1065_v52 }
 0xb42   : > { %v1085_v21 = vpack.c.bf16 %v1084_v20, %v1084_v20 }
 0xb44   : > { %v1087_v22 = vshll.u32 %v1085_v21, 16  ;;  %v1157_v23 = vunpack.c.l.b16 %v1085_v21 }
 0xb46   : > { %v1089_v25 = vrot.slane %v1087_v22, 7  ;;  %v1158_v26 = vpack.c.b16 %v1157_v23, %v1157_v23 }
 0xb48   : > { %1159 = vrot.lane.b32.xlu1 %v1158_v26, %s2236_s28  ;;  %v2537_v27 = vpack.i.bf16 %v1089_v25, %v788_v24 }
 0xb9f   : > { %v1180_v28 = vpop.permute.xlu0 %1179 }
 0xba0   : > { %1973 = vmatmul.msk.bf16.vlgmr.msrb.gmra.mxu3 %vm475_vm4, %v1180_v28  ;;  %1975 = vmatmul.msk.bf16.vlgmr.msra.gmra.mxu0 %vm475_vm4, %v1180_v28 }
 0xba1   : > { %1643 = vmatpush.bf16.msra.mxu0 %v2387_v45  ;;  %1618 = vmatpush.bf16.msrb.mxu3 %v2382_v44 }
 0xba5   : > { %1644 = vmatpush.bf16.msra.mxu0 %v2399_v47  ;;  %1619 = vmatpush.bf16.msrb.mxu3 %v2394_v46 }
 0xbba   : > { %v1160_v49 = vpop.permute.xlu1 %1159 }
 0xbbb   : > { %1972 = vmatmul.msk.bf16.vlgmr.msrb.gmra.mxu2 %vm475_vm4, %v1160_v49 }
 0xbbc   : > { %1553 = vmatpush.bf16.msrb.mxu2 %v2345_v5 }
 0xbc0   : > { %1554 = vmatpush.bf16.msrb.mxu2 %v2357_v9 }
 0xc1d   : > { %v1256_v29 = vpop.f32.mrf.mxu0 }
 0xc1e   : > { %v1261_v30 = vrot.slane %v1256_v29, 3 }
 0xc20   : > { %v1263_v31 = vadd.f32 %v1261_v30, %v2369_v18 }
 0xc22   : > { %2132 = vtanh.f32 %v1263_v31  ;;  %v1976_v9 = vmul.f32 -1.442695, %v1263_v31 }
 0xc23   : > { %v1193_v32 = vpop.f32.mrf.mxu3 }
 0xc25   : > { %v1258_v45 = vpop.f32.mrf.mxu0 }
 0xc28   : > { %v2133_v33 = vpop.eup %2132 }
 0xc29   : > { %1289 = vrot.lane.b32.xlu2 %v2133_v33, %s2235_s26 }
 0xc2b   : > { %v1195_v44 = vpop.f32.mrf.mxu3 }
 0xc3e   : > { %v1173_v47 = vpop.f32.mrf.mxu2 }
 0xc3f   : > { %v1194_v46 = vadd.f32 %v1193_v32, %v1173_v47 }
 0xc41   : > { %v1197_v34 = vadd.f32 %v1194_v46, %v2427_v58 }
 0xc43   : > { %2134 = vtanh.f32 %v1197_v34  ;;  %v1974_v39 = vmul.f32 -1.442695, %v1197_v34 }
 0xc44   : > { %2136 = vpow2.f32 %v1976_v9 }
 0xc46   : > { %v1175_v35 = vpop.f32.mrf.mxu2 }
 0xc49   : > { %v2135_v5 = vpop.eup %2134 }
 0xc4a   : > { %1220 = vrot.lane.b32.xlu0 %v2135_v5, %s2235_s26  ;;  %v2137_v36 = vpop.eup %2136 }
 0xc4b   : > { %v1267_v37 = vadd.f32 1.0, %v2137_v36 }
 0xc4d   : > { %2138 = vrcp.f32 %v1267_v37  ;;  %v1279_v50 = vand.u32 2147483648, %v1267_v37  ;;  %vm1273_vm13 = vweird.f32 %v1267_v37  ;;  %v1277_v42 = vand.u32 2147483647, %v1267_v37 }
 0xc4e   : > { %2140 = vpow2.f32 %v1974_v39 }
 0xc4f   : > { %v1280_v53 = vor.u32 1.1754944e-38, %v1279_v50  ;;  %vm1278_vm15 = vcmp.eq.f32.partialorder %v1277_v42, 8.507059e+37 }
 0xc53   : > { %v2139_v38 = vpop.eup %2138 }
 0xc54   : > { %v1269_v40 = vmul.f32 %v2139_v38, %v1267_v37  ;;  %vm1274_vm12 = vweird.f32 %v2139_v38  ;;  %v2141_v60 = vpop.eup %2140 }
 0xc55   : > { %vm1275_vm14 = vmor %vm1273_vm13, %vm1274_vm12  ;;  %v1201_v61 = vadd.f32 1.0, %v2141_v60 }
 0xc56   : > { %v1270_v41 = vsub.f32 1.0, %v1269_v40 }
 0xc57   : > { %2142 = vrcp.f32 %v1201_v61  ;;  %v1213_v4 = vand.u32 2147483648, %v1201_v61  ;;  %vm1207_vm1 = vweird.f32 %v1201_v61  ;;  %v1211_v7 = vand.u32 2147483647, %v1201_v61 }
 0xc58   : > { %v1271_v43 = vmul.f32 %v2139_v38, %v1270_v41 }
 0xc59   : > { %v1214_v10 = vor.u32 1.1754944e-38, %v1213_v4  ;;  %vm1212_vm3 = vcmp.eq.f32.partialorder %v1211_v7, 8.507059e+37 }
 0xc5a   : > { %v1272_v48 = vadd.f32 %v2139_v38, %v1271_v43 }
 0xc5c   : > { %v1276_v51 = vsel %vm1275_vm14, %v2139_v38, %v1272_v48 }
 0xc5d   : > { %v1281_v57 = vsel %vm1278_vm15, %v1280_v53, %v1276_v51  ;;  %v2143_v63 = vpop.eup %2142 }
 0xc5e   : > { %v1203_v0 = vmul.f32 %v2143_v63, %v1201_v61  ;;  %vm1208_vm0 = vweird.f32 %v2143_v63  ;;  %v1287_v62 = vmul.f32 %v1285_v15, %v1281_v57 }
 0xc5f   : > { %vm1209_vm2 = vmor %vm1207_vm1, %vm1208_vm0 }
 0xc60   : > { %v1204_v1 = vsub.f32 1.0, %v1203_v0 }
 0xc62   : > { %v1205_v3 = vmul.f32 %v2143_v63, %v1204_v1 }
 0xc64   : > { %v1206_v52 = vadd.f32 %v2143_v63, %v1205_v3 }
 0xc66   : > { %v1210_v8 = vsel %vm1209_vm2, %v2143_v63, %v1206_v52 }
 0xc67   : > { %v1215_v12 = vsel %vm1212_vm3, %v1214_v10, %v1210_v8 }
 0xc68   : > { %v1218_v19 = vmul.f32 %v1215_v12, %v2528_v13 }
 0xc83   : > { %v1290_v54 = vpop.permute.xlu2 %1289 }
 0xc84   : > { %v1292_v59 = vmul.f32 %v1290_v54, %v1281_v57 }
 0xc86   : > { %1294 = vrot.lane.b32.xlu1 %v1292_v59, %s2236_s28 }
 0xcbc   : > { %v1221_v11 = vpop.permute.xlu0 %1220 }
 0xcbd   : > { %v1223_v14 = vmul.f32 %v1221_v11, %v1215_v12 }
 0xcbf   : > { %1225 = vrot.lane.b32.xlu2 %v1223_v14, %s2236_s28 }
 0xcf8   : > { %v1295_v16 = vpop.permute.xlu1 %1294 }
 0xcf9   : > { %v2555_v17 = vadd.f32 %v1295_v16, %v1287_v62 }
 0xcfb   : > { %2144 = vtanh.f32 %v2555_v17 }
 0xd01   : > { %v2145_v2 = vpop.eup %2144 }
 0xd02   : > { %1300 = vrot.lane.b32.xlu0 %v2145_v2, %s2235_s26  ;;  %v1436_v2 = vrot.slane %v2555_v17, 7 }
 0xd19   : > { %v1226_v20 = vpop.permute.xlu2 %1225 }
 0xd1a   : > { %v2560_v21 = vadd.f32 %v1226_v20, %v1218_v19 }
 0xd1c   : > { %2146 = vtanh.f32 %v2560_v21 }
 0xd22   : > { %v2147_v22 = vpop.eup %2146 }
 0xd23   : > { %1231 = vrot.lane.b32.xlu1 %v2147_v22, %s2235_s26 }
 0xd74   : > { %v1301_v55 = vpop.permute.xlu0 %1300 }
 0xd75   : > { %v1303_v23 = vmul.f32 %v1301_v55, %v1281_v57 }
 0xd77   : > { %v1304_v24 = vpack.c.bf16 %v1303_v23, %v1303_v23 }
 0xd79   : > { %v1326_v25 = vshrl.u32 %v1304_v24, 16 }
 0xd7b   : > { %v1328_v26 = vrot.slane %v1326_v25, 2 }
 0xd7d   : > { %1329 = vrot.lane.b32.xlu2 %v1328_v26, %s2236_s28 }
 0xd95   : > { %v1232_v28 = vpop.permute.xlu1 %1231 }
 0xd96   : > { %v1234_v49 = vmul.f32 %v1232_v28, %v1215_v12 }
 0xd98   : > { %v2565_v29 = vpack.c.bf16 %v1234_v49, %v1234_v49 }
 0xd9a   : > { %v1305_v13 = vunpack.c.l.b16 %v2565_v29 }
 0xd9c   : > { %v1306_v30 = vpack.c.b16 %v1305_v13, %v1305_v13 }
 0xd9e   : > { %1307 = vrot.lane.b32.xlu0 %v1306_v30, %s2236_s28 }
 0xdd7   : > { %v1330_v31 = vpop.permute.xlu2 %1329 }
 0xdd8   : > { %1978 = vmatmul.msk.bf16.vlgmr.msra.gmra.mxu2 %vm475_vm4, %v1330_v31  ;;  %1980 = vmatmul.msk.bf16.vlgmr.msra.gmra.mxu3 %vm475_vm4, %v1330_v31 }
 0xe10   : > { %v1308_v32 = vpop.permute.xlu0 %1307 }
 0xe11   : > { %1977 = vmatmul.msk.bf16.vlgmr.msra.gmra.mxu1 %vm475_vm4, %v1308_v32 }
 0xe5b   : > { %v1343_v45 = vpop.f32.mrf.mxu2  ;;  %v1407_v33 = vpop.f32.mrf.mxu3 }
 0xe5c   : > { %v1412_v44 = vrot.slane %v1407_v33, 2 }
 0xe5e   : > { %v1414_v47 = vadd.f32 %v1412_v44, %v2369_v18 }
 0xe60   : > { %2148 = vtanh.f32 %v1414_v47  ;;  %v1981_v40 = vmul.f32 -1.442695, %v1414_v47 }
 0xe63   : > { %v1345_v46 = vpop.f32.mrf.mxu2  ;;  %v1409_v34 = vpop.f32.mrf.mxu3 }
 0xe66   : > { %v2149_v35 = vpop.eup %2148 }
 0xe67   : > { %1440 = vrot.lane.b32.xlu1 %v2149_v35, %s2235_s26 }
 0xe8e   : > { %v1321_v5 = vpop.f32.mrf.mxu1 }
 0xe8f   : > { %v1344_v9 = vadd.f32 %v1343_v45, %v1321_v5 }
 0xe91   : > { %v1347_v36 = vadd.f32 %v1344_v9, %v2427_v58 }
 0xe93   : > { %2150 = vtanh.f32 %v1347_v36  ;;  %v1979_v42 = vmul.f32 -1.442695, %v1347_v36 }
 0xe94   : > { %2152 = vpow2.f32 %v1981_v40  ;;  %v2601_v40 = vld [vmem:[%s2708_s6] sm:$0x1] }
 0xe96   : > { %v1323_v37 = vpop.f32.mrf.mxu1 }
 0xe99   : > { %v2151_v38 = vpop.eup %2150 }
 0xe9a   : > { %1370 = vrot.lane.b32.xlu2 %v2151_v38, %s2235_s26  ;;  %v2153_v41 = vpop.eup %2152 }
 0xe9b   : > { %v1418_v43 = vadd.f32 1.0, %v2153_v41 }
 0xe9d   : > { %2154 = vrcp.f32 %v1418_v43  ;;  %v1430_v58 = vand.u32 2147483648, %v1418_v43  ;;  %vm1424_vm6 = vweird.f32 %v1418_v43  ;;  %v1428_v39 = vand.u32 2147483647, %v1418_v43 }
 0xe9e   : > { %2156 = vpow2.f32 %v1979_v42 }
 0xe9f   : > { %v1431_v61 = vor.u32 1.1754944e-38, %v1430_v58  ;;  %vm1429_vm8 = vcmp.eq.f32.partialorder %v1428_v39, 8.507059e+37 }
 0xea3   : > { %v2155_v48 = vpop.eup %2154 }
 0xea4   : > { %v1420_v50 = vmul.f32 %v2155_v48, %v1418_v43  ;;  %v2157_v54 = vpop.eup %2156  ;;  %vm1425_vm5 = vweird.f32 %v2155_v48 }
 0xea5   : > { %v1351_v59 = vadd.f32 1.0, %v2157_v54  ;;  %vm1426_vm7 = vmor %vm1424_vm6, %vm1425_vm5 }
 0xea6   : > { %v1421_v51 = vsub.f32 1.0, %v1420_v50 }
 0xea7   : > { %2158 = vrcp.f32 %v1351_v59  ;;  %v1363_v10 = vand.u32 2147483648, %v1351_v59  ;;  %vm1357_vm10 = vweird.f32 %v1351_v59  ;;  %v1361_v11 = vand.u32 2147483647, %v1351_v59 }
 0xea8   : > { %v1422_v53 = vmul.f32 %v2155_v48, %v1421_v51 }
 0xea9   : > { %v1364_v14 = vor.u32 1.1754944e-38, %v1363_v10  ;;  %vm1362_vm12 = vcmp.eq.f32.partialorder %v1361_v11, 8.507059e+37 }
 0xeaa   : > { %v1423_v57 = vadd.f32 %v2155_v48, %v1422_v53 }
 0xeac   : > { %v1427_v60 = vsel %vm1426_vm7, %v2155_v48, %v1423_v57 }
 0xead   : > { %v1432_v63 = vsel %vm1429_vm8, %v1431_v61, %v1427_v60  ;;  %v2159_v3 = vpop.eup %2158 }
 0xeae   : > { %v1353_v52 = vmul.f32 %v2159_v3, %v1351_v59  ;;  %vm1358_vm9 = vweird.f32 %v2159_v3  ;;  %v1438_v19 = vmul.f32 %v1436_v2, %v1432_v63 }
 0xeaf   : > { %vm1359_vm11 = vmor %vm1357_vm10, %vm1358_vm9  ;;  %vm643_vm9 = vcmask 253952   ;;  %vm644_vm10 = vsmask.f32 256 }
 0xeb0   : > { %v1354_v4 = vsub.f32 1.0, %v1353_v52 }
 0xeb2   : > { %v1355_v7 = vmul.f32 %v2159_v3, %v1354_v4 }
 0xeb4   : > { %v1356_v8 = vadd.f32 %v2159_v3, %v1355_v7 }
 0xeb6   : > { %v1360_v12 = vsel %vm1359_vm11, %v2159_v3, %v1356_v8  ;;  %vm2633_vm11 = vmand %vm643_vm9, %vm644_vm10 }
 0xeb7   : > { %v1365_v62 = vsel %vm1362_vm12, %v1364_v14, %v1360_v12  ;;  %vm1541_vm12 = vcmask 257027  }
 0xeb8   : > { %v1368_v23 = vmul.f32 %v1365_v62, %v2560_v21 }
 0xed9   : > { %v1441_v0 = vpop.permute.xlu1 %1440 }
 0xeda   : > { %v1443_v1 = vmul.f32 %v1441_v0, %v1432_v63 }
 0xedc   : > { %1445 = vrot.lane.b32.xlu0 %v1443_v1, %s2236_s28 }
 0xef4   : > { %v1371_v15 = vpop.permute.xlu2 %1370 }
 0xef5   : > { %v1373_v16 = vmul.f32 %v1371_v15, %v1365_v62 }
 0xef7   : > { %1375 = vrot.lane.b32.xlu1 %v1373_v16, %s2236_s28 }
 0xf4e   : > { %v1446_v20 = vpop.permute.xlu0 %1445 }
 0xf4f   : > { %v2579_v22 = vadd.f32 %v1446_v20, %v1438_v19 }
 0xf51   : > { %2160 = vtanh.f32 %v2579_v22 }
 0xf57   : > { %v2161_v55 = vpop.eup %2160 }
 0xf58   : > { %1451 = vrot.lane.b32.xlu2 %v2161_v55, %s2235_s26  ;;  %v1585_v55 = vrot.slane %v2579_v22, 7 }
 0xf69   : > { %v1376_v24 = vpop.permute.xlu1 %1375 }
 0xf6a   : > { %v2584_v25 = vadd.f32 %v1376_v24, %v1368_v23 }
 0xf6c   : > { %2162 = vtanh.f32 %v2584_v25 }
 0xf72   : > { %v2163_v26 = vpop.eup %2162 }
 0xf73   : > { %1381 = vrot.lane.b32.xlu0 %v2163_v26, %s2235_s26 }
 0xfb2   : > { %v1452_v17 = vpop.permute.xlu2 %1451 }
 0xfb3   : > { %v1454_v28 = vmul.f32 %v1452_v17, %v1432_v63 }
 0xfb5   : > { %v1455_v49 = vpack.c.bf16 %v1454_v28, %v1454_v28 }
 0xfb7   : > { %v1478_v13 = vrot.slane %v1455_v49, 3 }
 0xfb9   : > { %1479 = vrot.lane.b32.xlu1 %v1478_v13, %s2236_s28 }
 0xfe5   : > { %v1382_v30 = vpop.permute.xlu0 %1381 }
 0xfe6   : > { %v1384_v31 = vmul.f32 %v1382_v30, %v1365_v62 }
 0xfe8   : > { %v2589_v32 = vpack.c.bf16 %v1384_v31, %v1384_v31 }
 0xfea   : > { %v1457_v21 = vunpack.c.l.b16 %v2589_v32 }
 0xfec   : > { %v1458_v45 = vpack.c.b16 %v1457_v21, %v1457_v21 }
 0xfee   : > { %1459 = vrot.lane.b32.xlu2 %v1458_v45, %s2236_s28 }
0x102b   : > { %v1480_v33 = vpop.permute.xlu1 %1479 }
0x102c   : > { %1983 = vmatmul.msk.bf16.vlgmr.msrb.gmra.mxu1 %vm475_vm4, %v1480_v33  ;;  %1985 = vmatmul.msk.bf16.vlgmr.msrb.gmra.mxu2 %vm475_vm4, %v1480_v33 }
0x1048   : > { %v1460_v44 = vpop.permute.xlu2 %1459 }
0x1049   : > { %1982 = vmatmul.msk.bf16.vlgmr.msrb.gmra.mxu0 %vm475_vm4, %v1460_v44 }
0x10a9   : > { %v1493_v47 = vpop.f32.mrf.mxu1 }
0x10af   : > { %v1556_v46 = vpop.f32.mrf.mxu2 }
0x10b0   : > { %v1561_v34 = vrot.slane %v1556_v46, 1 }
0x10b1   : > { %v1495_v35 = vpop.f32.mrf.mxu1 }
0x10b2   : > { %v1563_v5 = vadd.f32 %v1561_v34, %v2369_v18 }
0x10b4   : > { %2164 = vtanh.f32 %v1563_v5  ;;  %v1986_v18 = vmul.f32 -1.442695, %v1563_v5 }
0x10b7   : > { %v1558_v9 = vpop.f32.mrf.mxu2 }
0x10ba   : > { %v2165_v36 = vpop.eup %2164 }
0x10bb   : > { %1589 = vrot.lane.b32.xlu1 %v2165_v36, %s2235_s26 }
0x10c6   : > { %v1473_v37 = vpop.f32.mrf.mxu0 }
0x10c7   : > { %v1494_v38 = vadd.f32 %v1493_v47, %v1473_v37 }
0x10c9   : > { %v1497_v41 = vadd.f32 %v2601_v40, %v1494_v38 }
0x10cb   : > { %2166 = vtanh.f32 %v1497_v41  ;;  %v1984_v53 = vmul.f32 -1.442695, %v1497_v41 }
0x10cc   : > { %2168 = vpow2.f32 %v1986_v18 }
0x10ce   : > { %v1475_v43 = vpop.f32.mrf.mxu0 }
0x10d1   : > { %v2167_v48 = vpop.eup %2166 }
0x10d2   : > { %1520 = vrot.lane.b32.xlu0 %v2167_v48, %s2235_s26  ;;  %v2169_v50 = vpop.eup %2168 }
0x10d3   : > { %v1567_v42 = vadd.f32 1.0, %v2169_v50 }
0x10d5   : > { %2170 = vrcp.f32 %v1567_v42  ;;  %v1579_v61 = vand.u32 2147483648, %v1567_v42  ;;  %vm1573_vm14 = vweird.f32 %v1567_v42  ;;  %v1577_v63 = vand.u32 2147483647, %v1567_v42 }
0x10d6   : > { %2172 = vpow2.f32 %v1984_v53 }
0x10d7   : > { %v1580_v1 = vor.u32 1.1754944e-38, %v1579_v61  ;;  %vm1578_vm0 = vcmp.eq.f32.partialorder %v1577_v63, 8.507059e+37 }
0x10db   : > { %v2171_v51 = vpop.eup %2170 }
0x10dc   : > { %v1569_v54 = vmul.f32 %v2171_v51, %v1567_v42  ;;  %v2173_v58 = vpop.eup %2172  ;;  %vm1574_vm13 = vweird.f32 %v2171_v51 }
0x10dd   : > { %v1501_v39 = vadd.f32 1.0, %v2173_v58  ;;  %vm1575_vm15 = vmor %vm1573_vm14, %vm1574_vm13  ;;  %vm1542_vm13 = vsmask.f32 3328 }
0x10de   : > { %v1570_v57 = vsub.f32 1.0, %v1569_v54  ;;  %vm1543_vm14 = vmand %vm1541_vm12, %vm1542_vm13  ;;  %vm1696_vm13 = vsmask.f32 7950 }
0x10df   : > { %2174 = vrcp.f32 %v1501_v39  ;;  %v1513_v14 = vand.u32 2147483648, %v1501_v39  ;;  %vm1507_vm2 = vweird.f32 %v1501_v39  ;;  %v1511_v15 = vand.u32 2147483647, %v1501_v39 }
0x10e0   : > { %v1571_v59 = vmul.f32 %v2171_v51, %v1570_v57 }
0x10e1   : > { %v1514_v16 = vor.u32 1.1754944e-38, %v1513_v14  ;;  %vm1512_vm5 = vcmp.eq.f32.partialorder %v1511_v15, 8.507059e+37  ;;  %v1544_v14 = vld [vmem:[%s2334_s29] sm:$0x8] }
0x10e2   : > { %v1572_v60 = vadd.f32 %v2171_v51, %v1571_v59 }
0x10e4   : > { %v1576_v0 = vsel %vm1575_vm15, %v2171_v51, %v1572_v60  ;;  %vm941_vm15 = vcmask 254977  }
0x10e5   : > { %v1581_v52 = vsel %vm1578_vm0, %v1580_v1, %v1576_v0  ;;  %v2175_v4 = vpop.eup %2174  ;;  %vm942_vm0 = vsmask.f32 1280 }
0x10e6   : > { %v1503_v8 = vmul.f32 %v2175_v4, %v1501_v39  ;;  %vm1508_vm1 = vweird.f32 %v2175_v4  ;;  %v1587_v26 = vmul.f32 %v1585_v55, %v1581_v52 }
0x10e7   : > { %vm1509_vm3 = vmor %vm1507_vm2, %vm1508_vm1  ;;  %vm1093_vm2 = vsmask.f32 7942 }
0x10e8   : > { %v1504_v10 = vsub.f32 1.0, %v1503_v8  ;;  %v646_v8 = vld [vmem:[%s2334_s29] sm:$0x1]  ;;  %vm943_vm1 = vmand %vm941_vm15, %vm942_vm0 }
0x10ea   : > { %v1505_v11 = vmul.f32 %v2175_v4, %v1504_v10 }
0x10ec   : > { %v1506_v12 = vadd.f32 %v2175_v4, %v1505_v11  ;;  %v937_v11 = vrot.slane %v2504_v6, 7 }
0x10ee   : > { %v1510_v62 = vsel %vm1509_vm3, %v2175_v4, %v1506_v12  ;;  %vm793_vm3 = vsmask.f32 7938 }
0x10ef   : > { %v1515_v19 = vsel %vm1512_vm5, %v1514_v16, %v1510_v62  ;;  %v1712_v16 = vld [vmem:[#allocation2] sm:$0x1]  ;;  %vm1094_vm5 = vmand %vm941_vm15, %vm1093_vm2 }
0x10f0   : > { %v1518_v23 = vmul.f32 %v1515_v19, %v2584_v25  ;;  %vm1697_vm15 = vmand %vm1541_vm12, %vm1696_vm13 }
0x112d   : > { %v1590_v3 = vpop.permute.xlu1 %1589 }
0x112e   : > { %v1592_v7 = vmul.f32 %v1590_v3, %v1581_v52 }
0x1130   : > { %1594 = vrot.lane.b32.xlu0 %v1592_v7, %s2236_s28 }
0x1144   : > { %v1521_v2 = vpop.permute.xlu0 %1520 }
0x1145   : > { %v1523_v20 = vmul.f32 %v1521_v2, %v1515_v19 }
0x1147   : > { %1525 = vrot.lane.b32.xlu2 %v1523_v20, %s2236_s28 }
0x11a1   : > { %v1526_v24 = vpop.permute.xlu2 %1525 }
0x11a2   : > { %v2609_v17 = vadd.f32 %v1526_v24, %v1518_v23  ;;  %v1595_v28 = vpop.permute.xlu0 %1594 }
0x11a3   : > { %v2611_v49 = vadd.f32 %v1595_v28, %v1587_v26 }
0x11a4   : > { %2176 = vtanh.f32 %v2609_v17 }
0x11a5   : > { %2178 = vtanh.f32 %v2611_v49 }
0x11aa   : > { %v2177_v13 = vpop.eup %2176 }
0x11ab   : > { %v2179_v30 = vpop.eup %2178  ;;  %1531 = vrot.lane.b32.xlu1 %v2177_v13, %s2235_s26 }
0x11ac   : > { %1600 = vrot.lane.b32.xlu2 %v2179_v30, %s2235_s26 }
0x1206   : > { %v1601_v22 = vpop.permute.xlu2 %1600 }
0x1207   : > { %v2617_v31 = vmul.f32 %v1601_v22, %v1581_v52 }
0x1209   : > { %v1604_v25 = vpack.c.bf16 %v2617_v31, %v2617_v31 }
0x120b   : > { %v1626_v21 = vunpack.c.l.b16 %v1604_v25  ;;  %1702 = vst [vmem:[#allocation1] sm:$0xff] %v1604_v25 }
0x120d   : > { %v1627_v45 = vpack.c.b16 %v1626_v21, %v1626_v21 }
0x120f   : > { %v1629_v33 = vshrl.u32 %v1627_v45, 16 }
0x1211   : > { %v1631_v44 = vrot.slane %v1629_v33, 3 }
0x1212   : > { %v1704_v51 = vld [vmem:[#allocation1 + $0x3] ss:$4 sm:$0xff] }
0x1213   : > { %1632 = vrot.lane.b32.xlu1 %v1631_v44, %s2236_s28  ;;  %v1705_v53 = vshrl.u32 %v1704_v51, 16 }
0x121d   : > { %v1532_v47 = vpop.permute.xlu1 %1531 }
0x121e   : > { %v1534_v46 = vmul.f32 %v1532_v47, %v1515_v19 }
0x1220   : > { %v1535_v34 = vpack.c.bf16 %v1534_v46, %v1534_v46 }
0x1222   : > { %v1605_v35 = vunpack.c.l.b16 %v1535_v34  ;;  %v1537_v42 = vrot.slane %v1535_v34, 5 }
0x1224   : > { %v1606_v5 = vpack.c.b16 %v1605_v35, %v1605_v35 }
0x1226   : > { %1607 = vrot.lane.b32.xlu0 %v1606_v5, %s2236_s28  ;;  %v1244_v5 = vld [vmem:[%s2334_s29] sm:$0x4] }
0x1285   : > { %v1633_v9 = vpop.permute.xlu1 %1632 }
0x1286   : > { %1988 = vmatmul.msk.bf16.vlgmr.msra.gmra.mxu0 %vm475_vm4, %v1633_v9 }
0x1298   : > { %v1608_v36 = vpop.permute.xlu0 %1607 }
0x1299   : > { %1987 = vmatmul.msk.bf16.vlgmr.msrb.gmra.mxu3 %vm475_vm4, %v1608_v36 }
0x1303   : > { %v1646_v37 = vpop.f32.mrf.mxu0 }
0x130b   : > { %v1648_v38 = vpop.f32.mrf.mxu0 }
0x131c   : > { %v1621_v41 = vpop.f32.mrf.mxu3 }
0x131d   : > { %v1647_v43 = vadd.f32 %v1646_v37, %v1621_v41 }
0x131f   : > { %v1650_v48 = vadd.f32 %v2601_v40, %v1647_v43 }
0x1321   : > { %2180 = vtanh.f32 %v1650_v48  ;;  %v1989_v54 = vmul.f32 -1.442695, %v1650_v48 }
0x1323   : > { %2182 = vpow2.f32 %v1989_v54 }
0x1324   : > { %v1623_v18 = vpop.f32.mrf.mxu3 }
0x1327   : > { %v2181_v50 = vpop.eup %2180 }
0x1328   : > { %1673 = vrot.lane.b32.xlu2 %v2181_v50, %s2235_s26 }
0x1329   : > { %v2183_v57 = vpop.eup %2182 }
0x132a   : > { %v1654_v58 = vadd.f32 1.0, %v2183_v57 }
0x132c   : > { %2184 = vrcp.f32 %v1654_v58  ;;  %vm1660_vm6 = vweird.f32 %v1654_v58  ;;  %v1664_v63 = vand.u32 2147483647, %v1654_v58 }
0x132e   : > { %vm1665_vm8 = vcmp.eq.f32.partialorder %v1664_v63, 8.507059e+37 }
0x1330   : > { %640 = vrot.lane.b32.xlu2 %v2445_v56, %s2236_s28  ;;  %v1666_v56 = vand.u32 2147483648, %v1654_v58 }
0x1332   : > { %v2185_v40 = vpop.eup %2184  ;;  %v1667_v1 = vor.u32 1.1754944e-38, %v1666_v56 }
0x1333   : > { %v1656_v59 = vmul.f32 %v2185_v40, %v1654_v58  ;;  %vm1661_vm4 = vweird.f32 %v2185_v40 }
0x1334   : > { %vm1662_vm7 = vmor %vm1660_vm6, %vm1661_vm4  ;;  %vm1241_vm6 = vcmask 256002  }
0x1335   : > { %v1657_v39 = vsub.f32 1.0, %v1656_v59  ;;  %vm794_vm4 = vmand %vm643_vm9, %vm793_vm3 }
0x1337   : > { %v1658_v60 = vmul.f32 %v2185_v40, %v1657_v39 }
0x1338   : > { %1538 = vrot.lane.b32.xlu2 %v1537_v42, %s2236_s28 }
0x1339   : > { %v1659_v61 = vadd.f32 %v2185_v40, %v1658_v60 }
0x133b   : > { %v1663_v0 = vsel %vm1662_vm7, %v2185_v40, %v1659_v61  ;;  %vm1242_vm7 = vsmask.f32 2304 }
0x133c   : > { %v1668_v52 = vsel %vm1665_vm8, %v1667_v1, %v1663_v0  ;;  %vm1723_vm8 = vcmask 1040384   ;;  %vm1243_vm10 = vmand %vm1241_vm6, %vm1242_vm7 }
0x133d   : > { %v1671_v19 = vmul.f32 %v1668_v52, %v2609_v17  ;;  %v1237_v17 = vrot.slane %v2565_v29, 6  ;;  %v1387_v29 = vshll.u32 %v2589_v32, 16  ;;  %v1730_v32 = vld [vmem:[#allocation2 + $0x1] sm:$0x1] }
0x133f   : > { %v1389_v9 = vrot.slane %v1387_v29, 6 }
0x1340   : > { %1709 = vrot.lane.b32.xlu2 %v1705_v53, %s2236_s28 }
0x1382   : > { %v1674_v3 = vpop.permute.xlu2 %1673 }
0x1383   : > { %v1676_v4 = vmul.f32 %v1674_v3, %v1668_v52 }
0x1385   : > { %1678 = vrot.lane.b32.xlu0 %v1676_v4, %s2236_s28 }
0x138a   : > { %v641_v10 = vpop.permute.xlu2 %640 }
0x138b   : > { %v647_v12 = vsel %vm2633_vm11, %v641_v10, %v646_v8 }
0x138c   : > { %648 = vst [vmem:[%s2334_s29] sm:$0x1] %v647_v12 }
0x138d   : > { %938 = vrot.lane.b32.xlu0 %v937_v11, %s2236_s28 }
0x1392   : > { %v1539_v15 = vpop.permute.xlu2 %1538 }
0x1393   : > { %v1545_v62 = vsel %vm1543_vm14, %v1539_v15, %v1544_v14  ;;  %v795_v25 = vld [vmem:[%s2334_s29] sm:$0x1]  ;;  %vm1393_vm14 = vsmask.f32 7946 }
0x1394   : > { %1546 = vst [vmem:[%s2334_s29] sm:$0x8] %v1545_v62  ;;  %vm1394_vm0 = vmand %vm1241_vm6, %vm1393_vm14 }
0x1395   : > { %2048 = vrot.lane.b32.xlu0 %v2537_v27, %s2236_s28  ;;  %v944_v27 = vld [vmem:[%s2334_s29] sm:$0x2] }
0x139a   : > { %v1710_v6 = vpop.permute.xlu2 %1709 }
0x139b   : > { %v1713_v2 = vsel %vm2633_vm11, %v1710_v6, %v1712_v16  ;;  %v1698_v54 = vld [vmem:[%s2334_s29] sm:$0x8] }
0x139c   : > { %1714 = vst [vmem:[#allocation2] sm:$0x1] %v1713_v2 }
0x13f7   : > { %v1679_v20 = vpop.permute.xlu0 %1678 }
0x13f8   : > { %v1681_v55 = vadd.f32 %v1679_v20, %v1671_v19 }
0x13fa   : > { %2186 = vtanh.f32 %v1681_v55  ;;  %1734 = vrot.lane.b32.xlu2 %v1681_v55, %s2237_s16 }
0x13ff   : > { %v939_v23 = vpop.permute.xlu0 %938 }
0x1400   : > { %v2187_v24 = vpop.eup %2186  ;;  %v945_v26 = vsel %vm943_vm1, %v939_v23, %v944_v27  ;;  %vm1719_vm1 = vcmask 261127  }
0x1401   : > { %946 = vst [vmem:[%s2334_s29] sm:$0x2] %v945_v26  ;;  %1684 = vrot.lane.b32.xlu1 %v2187_v24, %s2235_s26  ;;  %s2238_s26 = smov (!%p1991_p8), 32  }
0x1407   : > { %v2049_v28 = vpop.permute.xlu0 %2048 }
0x1408   : > { %v1095_v13 = vld [vmem:[%s2334_s29] sm:$0x2]  ;;  %v2051_v30 = vunpack.i.h.bf16 %v2049_v28  ;;  %v2050_v22 = vunpack.i.l.bf16 %v2049_v28 }
0x1409   : > { %1238 = vrot.lane.b32.xlu1 %v1237_v17, %s2236_s28 }
0x140a   : > { %v1096_v21 = vsel %vm1094_vm5, %v2051_v30, %v1095_v13  ;;  %v796_v45 = vsel %vm794_vm4, %v2050_v22, %v795_v25 }
0x140b   : > { %1097 = vst [vmem:[%s2334_s29] sm:$0x2] %v1096_v21 }
0x140c   : > { %797 = vst [vmem:[%s2334_s29] sm:$0x1] %v796_v45 }
0x1454   : > { %v1735_v33 = vpop.permute.xlu2 %1734 }
0x1455   : > { %1738 = vst.msk [vmem:[#allocation3 + $0x1] sm:$0x1] %vm643_vm9, %v1735_v33 }
0x1473   : > { %v1685_v44 = vpop.permute.xlu1 %1684 }
0x1474   : > { %v1687_v47 = vmul.f32 %v1685_v44, %v1668_v52 }
0x1476   : > { %v1688_v46 = vpack.c.bf16 %v1687_v47, %v1687_v47 }
0x1478   : > { %v1690_v34 = vshll.u32 %v1688_v46, 16  ;;  %v1722_v35 = vrot.slane %v1688_v46, 3 }
0x147a   : > { %v1725_v36 = vsel %vm1723_vm8, %v1688_v46, %v1722_v35  ;;  %v1692_v37 = vrot.slane %v1690_v34, 5 }
0x147b   : > { %v1239_v38 = vpop.permute.xlu1 %1238  ;;  %1727 = vrot.lane.b32.xlu0 %v1725_v36, %s2236_s28 }
0x147c   : > { %v1245_v41 = vsel %vm1243_vm10, %v1239_v38, %v1244_v5  ;;  %v2052_v43 = vpack.i.bf16 %v1692_v37, %v1389_v9 }
0x147d   : > { %1246 = vst [vmem:[%s2334_s29] sm:$0x4] %v1245_v41 }
0x147e   : > { %2053 = vrot.lane.b32.xlu1 %v2052_v43, %s2236_s28 }
0x1484   : > { %v1395_v53 = vld [vmem:[%s2334_s29] sm:$0x4] }
0x1486   : > { %1716 = vrot.lane.b32.xlu1 %v2611_v49, %s2237_s16 }
0x14ed   : > { %v1728_v48 = vpop.permute.xlu0 %1727 }
0x14ee   : > { %v1731_v18 = vsel %vm2633_vm11, %v1728_v48, %v1730_v32 }
0x14ef   : > { %1732 = vst [vmem:[#allocation2 + $0x1] sm:$0x1] %v1731_v18 }
0x14f0   : > { %v2054_v50 = vpop.permute.xlu1 %2053 }
0x14f1   : > { %v2056_v42 = vunpack.i.h.bf16 %v2054_v50  ;;  %v2055_v51 = vunpack.i.l.bf16 %v2054_v50 }
0x14f3   : > { %v1699_v49 = vsel %vm1697_vm15, %v2056_v42, %v1698_v54  ;;  %v1396_v57 = vsel %vm1394_vm0, %v2055_v51, %v1395_v53 }
0x14f4   : > { %1700 = vst [vmem:[%s2334_s29] sm:$0x8] %v1699_v49 }
0x14f5   : > { %1397 = vst [vmem:[%s2334_s29] sm:$0x4] %v1396_v57  ;;  %1742 = sbr.rel (%p1991_p8) target bundleno = 5491 (0x1573), region = 56 }
0x14f8   : > { %v1717_v58 = vpop.permute.xlu1 %1716 }
0x14f9   : > { %1720 = vst.msk [vmem:[#allocation3 - $0x7] sm:$0x80] %vm1719_vm1, %v1717_v58 }
0x14fa   : > { %1755 = vst.msk [vmem:[%s2339_s10 - $0x7] sm:$0x80] %vm1719_vm1, %v1717_v58  ;;  %v2189_v40 = vpack.i.bf16 %v1687_v47, %v2617_v31 }
0x14fb   : > { %1756 = vst.msk [vmem:[%s2339_s10 + $0x1] sm:$0x1] %vm643_vm9, %v1735_v33 }
0x14fc   : > { %2190 = vrot.lane.b32.xlu0 %v2189_v40, %s2238_s26 }
0x156e   : > { %v2191_v59 = vpop.permute.xlu0 %2190 }
0x156f   : > { %v2193_v39 = vunpack.i.h.bf16 %v2191_v59  ;;  %v2192_v60 = vunpack.i.l.bf16 %v2191_v59 }
0x1571   : > { %1754 = vst.msk [vmem:[%s2326_s21 + $0x1] sm:$0x1] %vm643_vm9, %v2193_v39 }
0x1572   : > { %1748 = vst.msk [vmem:[%s2326_s21 - $0x7] sm:$0x80] %vm1719_vm1, %v2192_v60 }
0x1573 PF: > { %s20_s13 = sadd.s32 1, %s2232_s13   ;;  %s2716_s29 = sld [smem:[#allocation4_spill]] }
0x1574   : > { %p17_p9 = scmp.ge.s32.totalorder %s20_s13, 6   ;;  %s2717_s28 = sld [smem:[#allocation5_spill]] }
0x1575   : > { %s2718_s30 = smov %s2224_s11  ;;  %s2719_s10 = smov %s2228_s12 }
0x1576   :  { %19 = sbr.rel (!%p17_p9) target bundleno = 3 (0x3), region = 113 }
0x1579   : > { %s2720_s11 = smov %s2716_s29 }
0x157a   : > { %s2721_s12 = smov %s2717_s28 }

</bundles_post_ra>
